<compile_context>
chip_gen: v7x
topology: tpu7x:2x2x1
jax: 0.10.0
libtpu: 0.0.40
codegen_flags: <defaults>
</compile_context>

<pallas_src>
import functools

import jax
import jax.numpy as jnp
from jax.experimental import pallas as pl
from jax.experimental.pallas import tpu as pltpu


def _dot32(a, b):
    return jnp.dot(a, b, preferred_element_type=jnp.float32)


# --------------------------- Pallas kernels --------------------------------

def _conv_relu_pool_kernel(c00, c01, c10, c11, w_ref, b_ref, o_ref):
    """Fused conv (as matmul) + bias + ReLU + 2x2/2 maxpool for one batch tile.

    c** blocks: (1, K, bt*P) pool-member patch matrices (batch folded into the
    lane dim).  w_ref: (Cout, K) bf16, b_ref: (Cout, 1) f32,
    o_ref block: (1, Cout, bt*P) bf16.
    """
    w = w_ref[...]
    m = jnp.maximum(
        jnp.maximum(_dot32(w, c00[0]), _dot32(w, c01[0])),
        jnp.maximum(_dot32(w, c10[0]), _dot32(w, c11[0])))
    o_ref[0] = jnp.maximum(m + b_ref[...], 0.0).astype(o_ref.dtype)


def _fc_head_kernel(x_ref, wf1_ref, bf1_ref, wf2_ref, bf2_ref,
                    wf3_ref, bf3_ref, o_ref):
    """fc1+ReLU -> fc2+ReLU -> fc3 -> log_softmax for one batch tile.

    x block: (bf, 400) bf16, already in PyTorch (C,H,W) flatten order.
    """
    y = _dot32(x_ref[...], wf1_ref[...]) + bf1_ref[...]         # (bf, 120) f32
    y = jnp.maximum(y, 0.0).astype(jnp.bfloat16)
    y = _dot32(y, wf2_ref[...]) + bf2_ref[...]                  # (bf, 84) f32
    y = jnp.maximum(y, 0.0).astype(jnp.bfloat16)
    z = _dot32(y, wf3_ref[...]) + bf3_ref[...]                  # (bf, nb) f32
    # numerically-stable log_softmax, fused in (f32)
    z = z - jnp.max(z, axis=1, keepdims=True)
    z = z - jnp.log(jnp.sum(jnp.exp(z), axis=1, keepdims=True))
    o_ref[...] = z


# --------------------------- wrappers ---------------------------------------

def _full_spec(a):
    nd = a.ndim
    return pl.BlockSpec(a.shape, lambda t, _nd=nd: (0,) * _nd)


def _mosaic_params(block_bytes):
    # Size scoped VMEM from the actual per-step blocks (double-buffered) with
    # headroom; clamp to 32 MiB so it stays valid on v7x's 64 MiB VMEM.
    vmem = int(min(max(6 * block_bytes, 8 << 20), 32 << 20))
    return pltpu.CompilerParams(
        dimension_semantics=("parallel",),
        vmem_limit_bytes=vmem)


def _pool_grouped_patches(x_nchw, k):
    """For stride-1 'valid' kxk conv followed by 2x2/2 maxpool: return the 4
    im2col matrices (one per pool-window member), each (N, k*k*C, Hp*Wp);
    row order (di, dj, c), columns = pooled output positions (oh, ow)."""
    N, C, H, W = x_nchw.shape
    Hp, Wp = (H - k + 1) // 2, (W - k + 1) // 2
    mats = []
    for p in range(2):
        for q in range(2):
            slabs = [x_nchw[:, :, p + di:p + di + 2 * Hp:2,
                            q + dj:q + dj + 2 * Wp:2]
                     for di in range(k) for dj in range(k)]    # each (N,C,Hp,Wp)
            t = jnp.stack(slabs, axis=1)                       # (N,k*k,C,Hp,Wp)
            mats.append(t.reshape(N, k * k * C, Hp * Wp).astype(jnp.bfloat16))
    return mats, Hp, Wp


def _fold_batch_into_lanes(mats, bt):
    """(Np, K, P) -> (Np//bt, K, bt*P): fold the batch tile into the lane dim
    (columns ordered (sample-in-tile, pooled position))."""
    out = []
    for m in mats:
        Np, K, P = m.shape
        out.append(m.reshape(Np // bt, bt, K, P)
                    .transpose(0, 2, 1, 3)
                    .reshape(Np // bt, K, bt * P))
    return out


def conv_relu_pool(mats, w_mat, b_col):
    T, K, L = mats[0].shape
    cout = w_mat.shape[0]
    col_spec = pl.BlockSpec((1, K, L), lambda t: (t, 0, 0))
    block_bytes = (4 * K * L + cout * L) * 2 + K * cout * 2 + cout * 4
    flops = 4 * 2 * cout * K * L * T
    bytes_accessed = (4 * T * K * L + T * cout * L) * 2 + K * cout * 2
    return pl.pallas_call(
        _conv_relu_pool_kernel,
        out_shape=jax.ShapeDtypeStruct((T, cout, L), jnp.bfloat16),
        grid=(T,),
        in_specs=[col_spec] * 4 + [_full_spec(w_mat), _full_spec(b_col)],
        out_specs=pl.BlockSpec((1, cout, L), lambda t: (t, 0, 0)),
        compiler_params=_mosaic_params(block_bytes),
        cost_estimate=pl.CostEstimate(
            flops=int(flops), transcendentals=0,
            bytes_accessed=int(bytes_accessed)),
    )(*mats, w_mat, b_col)


def fc_head(xflat, kp, bf):
    Np, F = xflat.shape
    h1 = kp["wf1"].shape[1]
    h2 = kp["wf2"].shape[1]
    nb = kp["wf3"].shape[1]
    T = Np // bf
    weights = [kp["wf1"], kp["bf1"], kp["wf2"], kp["bf2"], kp["wf3"], kp["bf3"]]
    w_bytes = sum(int(w.size) * w.dtype.itemsize for w in weights)
    flops = 2 * Np * (F * h1 + h1 * h2 + h2 * nb)
    bytes_accessed = Np * F * 2 + Np * nb * 4 + w_bytes
    block_bytes = bf * F * 2 + bf * nb * 4 + w_bytes
    return pl.pallas_call(
        _fc_head_kernel,
        out_shape=jax.ShapeDtypeStruct((Np, nb), jnp.float32),
        grid=(T,),
        in_specs=[pl.BlockSpec((bf, F), lambda t: (t, 0))]
                 + [_full_spec(w) for w in weights],
        out_specs=pl.BlockSpec((bf, nb), lambda t: (t, 0)),
        compiler_params=_mosaic_params(block_bytes),
        cost_estimate=pl.CostEstimate(
            flops=int(flops), transcendentals=int(Np * (nb + 1)),
            bytes_accessed=int(bytes_accessed)),
    )(xflat, *weights)


# --------------------------- full forward -----------------------------------

def net_forward(x_nchw, kp, *, bt=8):
    N = x_nchw.shape[0]
    x = x_nchw.astype(jnp.float32)

    # Pad the batch to a multiple of the batch tile (zero samples, sliced off
    # at the end).
    Np = ((N + bt - 1) // bt) * bt
    if Np != N:
        x = jnp.pad(x, ((0, Np - N), (0, 0), (0, 0), (0, 0)))
    T = Np // bt

    c1o = kp["w1"].shape[0]
    c2o = kp["w2"].shape[0]

    # ---- stage 1: conv1 + bias + ReLU + maxpool (batch folded into lanes) --
    mats1, hp1, wp1 = _pool_grouped_patches(x, 5)          # 4 x (Np, 75, 196)
    mats1 = _fold_batch_into_lanes(mats1, bt)              # 4 x (T, 75, bt*196)
    p1 = conv_relu_pool(mats1, kp["w1"], kp["b1"])         # (T, 6, bt*196) bf16
    p1 = (p1.reshape(T, c1o, bt, hp1, wp1)
            .transpose(0, 2, 1, 3, 4)
            .reshape(Np, c1o, hp1, wp1))                   # (Np, 6, 14, 14)

    # ---- stage 2: conv2 + bias + ReLU + maxpool (batch folded into lanes) --
    mats2, hp2, wp2 = _pool_grouped_patches(p1, 5)         # 4 x (Np, 150, 25)
    mats2 = _fold_batch_into_lanes(mats2, bt)              # 4 x (T, 150, bt*25)
    p2 = conv_relu_pool(mats2, kp["w2"], kp["b2"])         # (T, 16, bt*25) bf16

    # flatten to PyTorch (C, H, W) order -> (Np, 400) bf16 (glue)
    flat = (p2.reshape(T, c2o, bt, hp2 * wp2)
              .transpose(0, 2, 1, 3)
              .reshape(Np, c2o * hp2 * wp2))

    # ---- stage 3: fc1/fc2/fc3 + log_softmax (batch in sublanes) ------------
    if Np <= 128:
        bf = Np
    else:
        bf = next((c for c in (128, 64, 32, 16, 8) if Np % c == 0), Np)
    out = fc_head(flat, kp, bf)                            # (Np, nb) f32
    return out[:N]


def prepare_params(params):
    """One-time layout prep: transpose/reshape/cast weights to kernel layout."""
    c1o, c1i, k, _ = params["w_conv1"].shape               # (6, 3, 5, 5)
    c2o, c2i, _, _ = params["w_conv2"].shape               # (16, 6, 5, 5)
    return {
        # conv weights -> (Cout, k*k*Cin) with row order (di, dj, ci)
        "w1": jnp.transpose(params["w_conv1"], (0, 2, 3, 1))
                 .reshape(c1o, k * k * c1i).astype(jnp.bfloat16),
        "b1": params["b_conv1"].reshape(c1o, 1).astype(jnp.float32),
        "w2": jnp.transpose(params["w_conv2"], (0, 2, 3, 1))
                 .reshape(c2o, k * k * c2i).astype(jnp.bfloat16),
        "b2": params["b_conv2"].reshape(c2o, 1).astype(jnp.float32),
        # fc weights pre-transposed; glue produces PyTorch flatten order
        "wf1": params["w_fc1"].T.astype(jnp.bfloat16),      # (400, 120)
        "bf1": params["b_fc1"].reshape(1, -1).astype(jnp.float32),
        "wf2": params["w_fc2"].T.astype(jnp.bfloat16),      # (120, 84)
        "bf2": params["b_fc2"].reshape(1, -1).astype(jnp.float32),
        "wf3": params["w_fc3"].T.astype(jnp.bfloat16),      # (84, nb)
        "bf3": params["b_fc3"].reshape(1, -1).astype(jnp.float32),
    }


def init_params(key, nb_classes):
    ks = jax.random.split(key, 10)
    s = 0.1
    return {
        "w_conv1": jax.random.normal(ks[0], (6, 3, 5, 5), jnp.float32) * s,
        "b_conv1": jax.random.normal(ks[1], (6,), jnp.float32) * s,
        "w_conv2": jax.random.normal(ks[2], (16, 6, 5, 5), jnp.float32) * s,
        "b_conv2": jax.random.normal(ks[3], (16,), jnp.float32) * s,
        "w_fc1": jax.random.normal(ks[4], (120, 400), jnp.float32) * s,
        "b_fc1": jax.random.normal(ks[5], (120,), jnp.float32) * s,
        "w_fc2": jax.random.normal(ks[6], (84, 120), jnp.float32) * s,
        "b_fc2": jax.random.normal(ks[7], (84,), jnp.float32) * s,
        "w_fc3": jax.random.normal(ks[8], (nb_classes, 84), jnp.float32) * s,
        "b_fc3": jax.random.normal(ks[9], (nb_classes,), jnp.float32) * s,
    }


if __name__ == "__main__":
    nb_classes = 10
    key = jax.random.PRNGKey(0)
    k_x, k_p = jax.random.split(key)

    # Architecture requires 32x32x3 input (16*5*5 flatten); batch=2.
    x = jax.random.normal(k_x, (2, 3, 32, 32), jnp.float32)
    params = init_params(k_p, nb_classes)
    kparams = prepare_params(params)

    fwd = jax.jit(functools.partial(net_forward, bt=8))
    out = jax.block_until_ready(fwd(x, kparams))

    assert out.shape == (2, nb_classes)
    # log_softmax rows should exponentiate-sum to ~1
    assert bool(jnp.all(jnp.abs(jnp.sum(jnp.exp(out), axis=1) - 1.0) < 1e-4))
    print("KERNEL_OK")
</pallas_src>

<mosaic_0001>
module attributes {stable_mosaic.version = 11 : i64} {
  func.func @_conv_relu_pool_kernel(%arg0: i32, %arg1: memref<1x75x1568xbf16, #tpu.memory_space<vmem>>, %arg2: memref<1x75x1568xbf16, #tpu.memory_space<vmem>>, %arg3: memref<1x75x1568xbf16, #tpu.memory_space<vmem>>, %arg4: memref<1x75x1568xbf16, #tpu.memory_space<vmem>>, %arg5: memref<6x75xbf16, #tpu.memory_space<vmem>>, %arg6: memref<6x1xf32, #tpu.memory_space<vmem>>, %arg7: memref<1x6x1568xbf16, #tpu.memory_space<vmem>>) attributes {dimension_semantics = [#tpu.dimension_semantics<parallel>], iteration_bounds = array<i64: 1>, scalar_prefetch = 0 : i64, scratch_operands = 0 : i64, tpu.core_type = #tpu.core_type<tc>, window_params = [{transform_indices = @transform_0, window_bounds = array<i64: 1, 75, 1568>}, {transform_indices = @transform_1, window_bounds = array<i64: 1, 75, 1568>}, {transform_indices = @transform_2, window_bounds = array<i64: 1, 75, 1568>}, {transform_indices = @transform_3, window_bounds = array<i64: 1, 75, 1568>}, {pipeline_mode = #tpu.pipeline_mode<synchronous>, transform_indices = @transform_4, window_bounds = array<i64: 6, 75>}, {pipeline_mode = #tpu.pipeline_mode<synchronous>, transform_indices = @transform_5, window_bounds = array<i64: 6, 1>}, {transform_indices = @transform_6, window_bounds = array<i64: 1, 6, 1568>}]} {
    %c0 = arith.constant 0 : index
    %c0_0 = arith.constant 0 : index
    %0 = vector.load %arg5[%c0, %c0_0] : memref<6x75xbf16, #tpu.memory_space<vmem>>, vector<6x75xbf16>
    %c0_1 = arith.constant 0 : index
    %c0_2 = arith.constant 0 : index
    %c0_3 = arith.constant 0 : index
    %1 = vector.load %arg1[%c0_1, %c0_2, %c0_3] : memref<1x75x1568xbf16, #tpu.memory_space<vmem>>, vector<1x75x1568xbf16>
    %2 = vector.shape_cast %1 : vector<1x75x1568xbf16> to vector<75x1568xbf16>
    %cst = arith.constant dense<0.000000e+00> : vector<6x1568xf32>
    %3 = tpu.matmul %0, %2, %cst {dimension_numbers = #tpu.dot_dimension_numbers<[1], [0], [0], [1], [0, 0, 1, 1], [], []>} : vector<6x75xbf16>, vector<75x1568xbf16>, vector<6x1568xf32> -> vector<6x1568xf32>
    %c0_4 = arith.constant 0 : index
    %c0_5 = arith.constant 0 : index
    %c0_6 = arith.constant 0 : index
    %4 = vector.load %arg2[%c0_4, %c0_5, %c0_6] : memref<1x75x1568xbf16, #tpu.memory_space<vmem>>, vector<1x75x1568xbf16>
    %5 = vector.shape_cast %4 : vector<1x75x1568xbf16> to vector<75x1568xbf16>
    %cst_7 = arith.constant dense<0.000000e+00> : vector<6x1568xf32>
    %6 = tpu.matmul %0, %5, %cst_7 {dimension_numbers = #tpu.dot_dimension_numbers<[1], [0], [0], [1], [0, 0, 1, 1], [], []>} : vector<6x75xbf16>, vector<75x1568xbf16>, vector<6x1568xf32> -> vector<6x1568xf32>
    %7 = arith.maximumf %3, %6 : vector<6x1568xf32>
    %c0_8 = arith.constant 0 : index
    %c0_9 = arith.constant 0 : index
    %c0_10 = arith.constant 0 : index
    %8 = vector.load %arg3[%c0_8, %c0_9, %c0_10] : memref<1x75x1568xbf16, #tpu.memory_space<vmem>>, vector<1x75x1568xbf16>
    %9 = vector.shape_cast %8 : vector<1x75x1568xbf16> to vector<75x1568xbf16>
    %cst_11 = arith.constant dense<0.000000e+00> : vector<6x1568xf32>
    %10 = tpu.matmul %0, %9, %cst_11 {dimension_numbers = #tpu.dot_dimension_numbers<[1], [0], [0], [1], [0, 0, 1, 1], [], []>} : vector<6x75xbf16>, vector<75x1568xbf16>, vector<6x1568xf32> -> vector<6x1568xf32>
    %c0_12 = arith.constant 0 : index
    %c0_13 = arith.constant 0 : index
    %c0_14 = arith.constant 0 : index
    %11 = vector.load %arg4[%c0_12, %c0_13, %c0_14] : memref<1x75x1568xbf16, #tpu.memory_space<vmem>>, vector<1x75x1568xbf16>
    %12 = vector.shape_cast %11 : vector<1x75x1568xbf16> to vector<75x1568xbf16>
    %cst_15 = arith.constant dense<0.000000e+00> : vector<6x1568xf32>
    %13 = tpu.matmul %0, %12, %cst_15 {dimension_numbers = #tpu.dot_dimension_numbers<[1], [0], [0], [1], [0, 0, 1, 1], [], []>} : vector<6x75xbf16>, vector<75x1568xbf16>, vector<6x1568xf32> -> vector<6x1568xf32>
    %14 = arith.maximumf %10, %13 : vector<6x1568xf32>
    %15 = arith.maximumf %7, %14 : vector<6x1568xf32>
    %c0_16 = arith.constant 0 : index
    %c0_17 = arith.constant 0 : index
    %16 = vector.load %arg6[%c0_16, %c0_17] : memref<6x1xf32, #tpu.memory_space<vmem>>, vector<6x1xf32>
    %17 = vector.broadcast %16 : vector<6x1xf32> to vector<6x1568xf32>
    %18 = arith.addf %15, %17 : vector<6x1568xf32>
    %cst_18 = arith.constant 0.000000e+00 : f32
    %19 = vector.broadcast %cst_18 : f32 to vector<6x1568xf32>
    %20 = arith.maximumf %18, %19 : vector<6x1568xf32>
    %21 = arith.truncf %20 : vector<6x1568xf32> to vector<6x1568xbf16>
    %c0_19 = arith.constant 0 : index
    %c0_20 = arith.constant 0 : index
    %c0_21 = arith.constant 0 : index
    %22 = vector.load %arg7[%c0_19, %c0_20, %c0_21] : memref<1x6x1568xbf16, #tpu.memory_space<vmem>>, vector<1x6x1568xbf16>
    %23 = vector.shape_cast %22 : vector<1x6x1568xbf16> to vector<6x1568xbf16>
    %24 = vector.shape_cast %21 : vector<6x1568xbf16> to vector<1x6x1568xbf16>
    tpu.vector_store %arg7[%c0_19, %c0_20, %c0_21], %24 {strides = array<i32>} : memref<1x6x1568xbf16, #tpu.memory_space<vmem>>, vector<1x6x1568xbf16>,
    return
  }
  func.func @transform_0(%arg0: i32) -> (i32, i32, i32) {
    %c0_i32 = arith.constant 0 : i32
    %c0_i32_0 = arith.constant 0 : i32
    %c0_i32_1 = arith.constant 0 : i32
    return %arg0, %c0_i32, %c0_i32_0 : i32, i32, i32
  }
  func.func @transform_1(%arg0: i32) -> (i32, i32, i32) {
    %c0_i32 = arith.constant 0 : i32
    %c0_i32_0 = arith.constant 0 : i32
    %c0_i32_1 = arith.constant 0 : i32
    return %arg0, %c0_i32, %c0_i32_0 : i32, i32, i32
  }
  func.func @transform_2(%arg0: i32) -> (i32, i32, i32) {
    %c0_i32 = arith.constant 0 : i32
    %c0_i32_0 = arith.constant 0 : i32
    %c0_i32_1 = arith.constant 0 : i32
    return %arg0, %c0_i32, %c0_i32_0 : i32, i32, i32
  }
  func.func @transform_3(%arg0: i32) -> (i32, i32, i32) {
    %c0_i32 = arith.constant 0 : i32
    %c0_i32_0 = arith.constant 0 : i32
    %c0_i32_1 = arith.constant 0 : i32
    return %arg0, %c0_i32, %c0_i32_0 : i32, i32, i32
  }
  func.func @transform_4(%arg0: i32) -> (i32, i32) {
    %c0_i32 = arith.constant 0 : i32
    %c0_i32_0 = arith.constant 0 : i32
    %c0_i32_1 = arith.constant 0 : i32
    return %c0_i32, %c0_i32_0 : i32, i32
  }
  func.func @transform_5(%arg0: i32) -> (i32, i32) {
    %c0_i32 = arith.constant 0 : i32
    %c0_i32_0 = arith.constant 0 : i32
    %c0_i32_1 = arith.constant 0 : i32
    return %c0_i32, %c0_i32_0 : i32, i32
  }
  func.func @transform_6(%arg0: i32) -> (i32, i32, i32) {
    %c0_i32 = arith.constant 0 : i32
    %c0_i32_0 = arith.constant 0 : i32
    %c0_i32_1 = arith.constant 0 : i32
    return %arg0, %c0_i32, %c0_i32_0 : i32, i32, i32
  }
}

module attributes {stable_mosaic.version = 11 : i64} {
  func.func @_conv_relu_pool_kernel(%arg0: i32, %arg1: memref<1x150x200xbf16, #tpu.memory_space<vmem>>, %arg2: memref<1x150x200xbf16, #tpu.memory_space<vmem>>, %arg3: memref<1x150x200xbf16, #tpu.memory_space<vmem>>, %arg4: memref<1x150x200xbf16, #tpu.memory_space<vmem>>, %arg5: memref<16x150xbf16, #tpu.memory_space<vmem>>, %arg6: memref<16x1xf32, #tpu.memory_space<vmem>>, %arg7: memref<1x16x200xbf16, #tpu.memory_space<vmem>>) attributes {dimension_semantics = [#tpu.dimension_semantics<parallel>], iteration_bounds = array<i64: 1>, scalar_prefetch = 0 : i64, scratch_operands = 0 : i64, tpu.core_type = #tpu.core_type<tc>, window_params = [{transform_indices = @transform_0, window_bounds = array<i64: 1, 150, 200>}, {transform_indices = @transform_1, window_bounds = array<i64: 1, 150, 200>}, {transform_indices = @transform_2, window_bounds = array<i64: 1, 150, 200>}, {transform_indices = @transform_3, window_bounds = array<i64: 1, 150, 200>}, {pipeline_mode = #tpu.pipeline_mode<synchronous>, transform_indices = @transform_4, window_bounds = array<i64: 16, 150>}, {pipeline_mode = #tpu.pipeline_mode<synchronous>, transform_indices = @transform_5, window_bounds = array<i64: 16, 1>}, {transform_indices = @transform_6, window_bounds = array<i64: 1, 16, 200>}]} {
    %c0 = arith.constant 0 : index
    %c0_0 = arith.constant 0 : index
    %0 = vector.load %arg5[%c0, %c0_0] : memref<16x150xbf16, #tpu.memory_space<vmem>>, vector<16x150xbf16>
    %c0_1 = arith.constant 0 : index
    %c0_2 = arith.constant 0 : index
    %c0_3 = arith.constant 0 : index
    %1 = vector.load %arg1[%c0_1, %c0_2, %c0_3] : memref<1x150x200xbf16, #tpu.memory_space<vmem>>, vector<1x150x200xbf16>
    %2 = vector.shape_cast %1 : vector<1x150x200xbf16> to vector<150x200xbf16>
    %cst = arith.constant dense<0.000000e+00> : vector<16x200xf32>
    %3 = tpu.matmul %0, %2, %cst {dimension_numbers = #tpu.dot_dimension_numbers<[1], [0], [0], [1], [0, 0, 1, 1], [], []>} : vector<16x150xbf16>, vector<150x200xbf16>, vector<16x200xf32> -> vector<16x200xf32>
    %c0_4 = arith.constant 0 : index
    %c0_5 = arith.constant 0 : index
    %c0_6 = arith.constant 0 : index
    %4 = vector.load %arg2[%c0_4, %c0_5, %c0_6] : memref<1x150x200xbf16, #tpu.memory_space<vmem>>, vector<1x150x200xbf16>
    %5 = vector.shape_cast %4 : vector<1x150x200xbf16> to vector<150x200xbf16>
    %cst_7 = arith.constant dense<0.000000e+00> : vector<16x200xf32>
    %6 = tpu.matmul %0, %5, %cst_7 {dimension_numbers = #tpu.dot_dimension_numbers<[1], [0], [0], [1], [0, 0, 1, 1], [], []>} : vector<16x150xbf16>, vector<150x200xbf16>, vector<16x200xf32> -> vector<16x200xf32>
    %7 = arith.maximumf %3, %6 : vector<16x200xf32>
    %c0_8 = arith.constant 0 : index
    %c0_9 = arith.constant 0 : index
    %c0_10 = arith.constant 0 : index
    %8 = vector.load %arg3[%c0_8, %c0_9, %c0_10] : memref<1x150x200xbf16, #tpu.memory_space<vmem>>, vector<1x150x200xbf16>
    %9 = vector.shape_cast %8 : vector<1x150x200xbf16> to vector<150x200xbf16>
    %cst_11 = arith.constant dense<0.000000e+00> : vector<16x200xf32>
    %10 = tpu.matmul %0, %9, %cst_11 {dimension_numbers = #tpu.dot_dimension_numbers<[1], [0], [0], [1], [0, 0, 1, 1], [], []>} : vector<16x150xbf16>, vector<150x200xbf16>, vector<16x200xf32> -> vector<16x200xf32>
    %c0_12 = arith.constant 0 : index
    %c0_13 = arith.constant 0 : index
    %c0_14 = arith.constant 0 : index
    %11 = vector.load %arg4[%c0_12, %c0_13, %c0_14] : memref<1x150x200xbf16, #tpu.memory_space<vmem>>, vector<1x150x200xbf16>
    %12 = vector.shape_cast %11 : vector<1x150x200xbf16> to vector<150x200xbf16>
    %cst_15 = arith.constant dense<0.000000e+00> : vector<16x200xf32>
    %13 = tpu.matmul %0, %12, %cst_15 {dimension_numbers = #tpu.dot_dimension_numbers<[1], [0], [0], [1], [0, 0, 1, 1], [], []>} : vector<16x150xbf16>, vector<150x200xbf16>, vector<16x200xf32> -> vector<16x200xf32>
    %14 = arith.maximumf %10, %13 : vector<16x200xf32>
    %15 = arith.maximumf %7, %14 : vector<16x200xf32>
    %c0_16 = arith.constant 0 : index
    %c0_17 = arith.constant 0 : index
    %16 = vector.load %arg6[%c0_16, %c0_17] : memref<16x1xf32, #tpu.memory_space<vmem>>, vector<16x1xf32>
    %17 = vector.broadcast %16 : vector<16x1xf32> to vector<16x200xf32>
    %18 = arith.addf %15, %17 : vector<16x200xf32>
    %cst_18 = arith.constant 0.000000e+00 : f32
    %19 = vector.broadcast %cst_18 : f32 to vector<16x200xf32>
    %20 = arith.maximumf %18, %19 : vector<16x200xf32>
    %21 = arith.truncf %20 : vector<16x200xf32> to vector<16x200xbf16>
    %c0_19 = arith.constant 0 : index
    %c0_20 = arith.constant 0 : index
    %c0_21 = arith.constant 0 : index
    %22 = vector.load %arg7[%c0_19, %c0_20, %c0_21] : memref<1x16x200xbf16, #tpu.memory_space<vmem>>, vector<1x16x200xbf16>
    %23 = vector.shape_cast %22 : vector<1x16x200xbf16> to vector<16x200xbf16>
    %24 = vector.shape_cast %21 : vector<16x200xbf16> to vector<1x16x200xbf16>
    tpu.vector_store %arg7[%c0_19, %c0_20, %c0_21], %24 {strides = array<i32>} : memref<1x16x200xbf16, #tpu.memory_space<vmem>>, vector<1x16x200xbf16>,
    return
  }
  func.func @transform_0(%arg0: i32) -> (i32, i32, i32) {
    %c0_i32 = arith.constant 0 : i32
    %c0_i32_0 = arith.constant 0 : i32
    %c0_i32_1 = arith.constant 0 : i32
    return %arg0, %c0_i32, %c0_i32_0 : i32, i32, i32
  }
  func.func @transform_1(%arg0: i32) -> (i32, i32, i32) {
    %c0_i32 = arith.constant 0 : i32
    %c0_i32_0 = arith.constant 0 : i32
    %c0_i32_1 = arith.constant 0 : i32
    return %arg0, %c0_i32, %c0_i32_0 : i32, i32, i32
  }
  func.func @transform_2(%arg0: i32) -> (i32, i32, i32) {
    %c0_i32 = arith.constant 0 : i32
    %c0_i32_0 = arith.constant 0 : i32
    %c0_i32_1 = arith.constant 0 : i32
    return %arg0, %c0_i32, %c0_i32_0 : i32, i32, i32
  }
  func.func @transform_3(%arg0: i32) -> (i32, i32, i32) {
    %c0_i32 = arith.constant 0 : i32
    %c0_i32_0 = arith.constant 0 : i32
    %c0_i32_1 = arith.constant 0 : i32
    return %arg0, %c0_i32, %c0_i32_0 : i32, i32, i32
  }
  func.func @transform_4(%arg0: i32) -> (i32, i32) {
    %c0_i32 = arith.constant 0 : i32
    %c0_i32_0 = arith.constant 0 : i32
    %c0_i32_1 = arith.constant 0 : i32
    return %c0_i32, %c0_i32_0 : i32, i32
  }
  func.func @transform_5(%arg0: i32) -> (i32, i32) {
    %c0_i32 = arith.constant 0 : i32
    %c0_i32_0 = arith.constant 0 : i32
    %c0_i32_1 = arith.constant 0 : i32
    return %c0_i32, %c0_i32_0 : i32, i32
  }
  func.func @transform_6(%arg0: i32) -> (i32, i32, i32) {
    %c0_i32 = arith.constant 0 : i32
    %c0_i32_0 = arith.constant 0 : i32
    %c0_i32_1 = arith.constant 0 : i32
    return %arg0, %c0_i32, %c0_i32_0 : i32, i32, i32
  }
}

module attributes {stable_mosaic.version = 11 : i64} {
  func.func @_fc_head_kernel(%arg0: i32, %arg1: memref<8x400xbf16, #tpu.memory_space<vmem>>, %arg2: memref<400x120xbf16, #tpu.memory_space<vmem>>, %arg3: memref<1x120xf32, #tpu.memory_space<vmem>>, %arg4: memref<120x84xbf16, #tpu.memory_space<vmem>>, %arg5: memref<1x84xf32, #tpu.memory_space<vmem>>, %arg6: memref<84x10xbf16, #tpu.memory_space<vmem>>, %arg7: memref<1x10xf32, #tpu.memory_space<vmem>>, %arg8: memref<8x10xf32, #tpu.memory_space<vmem>>) attributes {dimension_semantics = [#tpu.dimension_semantics<parallel>], iteration_bounds = array<i64: 1>, scalar_prefetch = 0 : i64, scratch_operands = 0 : i64, tpu.core_type = #tpu.core_type<tc>, window_params = [{transform_indices = @transform_0, window_bounds = array<i64: 8, 400>}, {pipeline_mode = #tpu.pipeline_mode<synchronous>, transform_indices = @transform_1, window_bounds = array<i64: 400, 120>}, {pipeline_mode = #tpu.pipeline_mode<synchronous>, transform_indices = @transform_2, window_bounds = array<i64: 1, 120>}, {pipeline_mode = #tpu.pipeline_mode<synchronous>, transform_indices = @transform_3, window_bounds = array<i64: 120, 84>}, {pipeline_mode = #tpu.pipeline_mode<synchronous>, transform_indices = @transform_4, window_bounds = array<i64: 1, 84>}, {pipeline_mode = #tpu.pipeline_mode<synchronous>, transform_indices = @transform_5, window_bounds = array<i64: 84, 10>}, {pipeline_mode = #tpu.pipeline_mode<synchronous>, transform_indices = @transform_6, window_bounds = array<i64: 1, 10>}, {transform_indices = @transform_7, window_bounds = array<i64: 8, 10>}]} {
    %c0 = arith.constant 0 : index
    %c0_0 = arith.constant 0 : index
    %0 = vector.load %arg1[%c0, %c0_0] : memref<8x400xbf16, #tpu.memory_space<vmem>>, vector<8x400xbf16>
    %c0_1 = arith.constant 0 : index
    %c0_2 = arith.constant 0 : index
    %1 = vector.load %arg2[%c0_1, %c0_2] : memref<400x120xbf16, #tpu.memory_space<vmem>>, vector<400x120xbf16>
    %cst = arith.constant dense<0.000000e+00> : vector<8x120xf32>
    %2 = tpu.matmul %0, %1, %cst {dimension_numbers = #tpu.dot_dimension_numbers<[1], [0], [0], [1], [0, 0, 1, 1], [], []>} : vector<8x400xbf16>, vector<400x120xbf16>, vector<8x120xf32> -> vector<8x120xf32>
    %c0_3 = arith.constant 0 : index
    %c0_4 = arith.constant 0 : index
    %3 = vector.load %arg3[%c0_3, %c0_4] : memref<1x120xf32, #tpu.memory_space<vmem>>, vector<1x120xf32>
    %4 = vector.broadcast %3 : vector<1x120xf32> to vector<8x120xf32>
    %5 = arith.addf %2, %4 : vector<8x120xf32>
    %cst_5 = arith.constant 0.000000e+00 : f32
    %6 = vector.broadcast %cst_5 : f32 to vector<8x120xf32>
    %7 = arith.maximumf %5, %6 : vector<8x120xf32>
    %8 = arith.truncf %7 : vector<8x120xf32> to vector<8x120xbf16>
    %c0_6 = arith.constant 0 : index
    %c0_7 = arith.constant 0 : index
    %9 = vector.load %arg4[%c0_6, %c0_7] : memref<120x84xbf16, #tpu.memory_space<vmem>>, vector<120x84xbf16>
    %cst_8 = arith.constant dense<0.000000e+00> : vector<8x84xf32>
    %10 = tpu.matmul %8, %9, %cst_8 {dimension_numbers = #tpu.dot_dimension_numbers<[1], [0], [0], [1], [0, 0, 1, 1], [], []>} : vector<8x120xbf16>, vector<120x84xbf16>, vector<8x84xf32> -> vector<8x84xf32>
    %c0_9 = arith.constant 0 : index
    %c0_10 = arith.constant 0 : index
    %11 = vector.load %arg5[%c0_9, %c0_10] : memref<1x84xf32, #tpu.memory_space<vmem>>, vector<1x84xf32>
    %12 = vector.broadcast %11 : vector<1x84xf32> to vector<8x84xf32>
    %13 = arith.addf %10, %12 : vector<8x84xf32>
    %cst_11 = arith.constant 0.000000e+00 : f32
    %14 = vector.broadcast %cst_11 : f32 to vector<8x84xf32>
    %15 = arith.maximumf %13, %14 : vector<8x84xf32>
    %16 = arith.truncf %15 : vector<8x84xf32> to vector<8x84xbf16>
    %c0_12 = arith.constant 0 : index
    %c0_13 = arith.constant 0 : index
    %17 = vector.load %arg6[%c0_12, %c0_13] : memref<84x10xbf16, #tpu.memory_space<vmem>>, vector<84x10xbf16>
    %cst_14 = arith.constant dense<0.000000e+00> : vector<8x10xf32>
    %18 = tpu.matmul %16, %17, %cst_14 {dimension_numbers = #tpu.dot_dimension_numbers<[1], [0], [0], [1], [0, 0, 1, 1], [], []>} : vector<8x84xbf16>, vector<84x10xbf16>, vector<8x10xf32> -> vector<8x10xf32>
    %c0_15 = arith.constant 0 : index
    %c0_16 = arith.constant 0 : index
    %19 = vector.load %arg7[%c0_15, %c0_16] : memref<1x10xf32, #tpu.memory_space<vmem>>, vector<1x10xf32>
    %20 = vector.broadcast %19 : vector<1x10xf32> to vector<8x10xf32>
    %21 = arith.addf %18, %20 : vector<8x10xf32>
    %cst_17 = arith.constant dense<0xFF800000> : vector<8xf32>
    %22 = vector.multi_reduction <maximumf>, %21, %cst_17 [1] : vector<8x10xf32> to vector<8xf32>
    %23 = vector.shape_cast %22 : vector<8xf32> to vector<8x1xf32>
    %24 = vector.broadcast %23 : vector<8x1xf32> to vector<8x10xf32>
    %25 = arith.subf %21, %24 : vector<8x10xf32>
    %26 = math.exp %25 : vector<8x10xf32>
    %cst_18 = arith.constant dense<0.000000e+00> : vector<8xf32>
    %27 = vector.multi_reduction <add>, %26, %cst_18 [1] : vector<8x10xf32> to vector<8xf32>
    %28 = vector.shape_cast %27 : vector<8xf32> to vector<8x1xf32>
    %29 = math.log %28 : vector<8x1xf32>
    %30 = vector.broadcast %29 : vector<8x1xf32> to vector<8x10xf32>
    %31 = arith.subf %25, %30 : vector<8x10xf32>
    %c0_19 = arith.constant 0 : index
    %c0_20 = arith.constant 0 : index
    %32 = vector.load %arg8[%c0_19, %c0_20] : memref<8x10xf32, #tpu.memory_space<vmem>>, vector<8x10xf32>
    tpu.vector_store %arg8[%c0_19, %c0_20], %31 {strides = array<i32>} : memref<8x10xf32, #tpu.memory_space<vmem>>, vector<8x10xf32>,
    return
  }
  func.func @transform_0(%arg0: i32) -> (i32, i32) {
    %c0_i32 = arith.constant 0 : i32
    %c0_i32_0 = arith.constant 0 : i32
    return %arg0, %c0_i32 : i32, i32
  }
  func.func @transform_1(%arg0: i32) -> (i32, i32) {
    %c0_i32 = arith.constant 0 : i32
    %c0_i32_0 = arith.constant 0 : i32
    %c0_i32_1 = arith.constant 0 : i32
    return %c0_i32, %c0_i32_0 : i32, i32
  }
  func.func @transform_2(%arg0: i32) -> (i32, i32) {
    %c0_i32 = arith.constant 0 : i32
    %c0_i32_0 = arith.constant 0 : i32
    %c0_i32_1 = arith.constant 0 : i32
    return %c0_i32, %c0_i32_0 : i32, i32
  }
  func.func @transform_3(%arg0: i32) -> (i32, i32) {
    %c0_i32 = arith.constant 0 : i32
    %c0_i32_0 = arith.constant 0 : i32
    %c0_i32_1 = arith.constant 0 : i32
    return %c0_i32, %c0_i32_0 : i32, i32
  }
  func.func @transform_4(%arg0: i32) -> (i32, i32) {
    %c0_i32 = arith.constant 0 : i32
    %c0_i32_0 = arith.constant 0 : i32
    %c0_i32_1 = arith.constant 0 : i32
    return %c0_i32, %c0_i32_0 : i32, i32
  }
  func.func @transform_5(%arg0: i32) -> (i32, i32) {
    %c0_i32 = arith.constant 0 : i32
    %c0_i32_0 = arith.constant 0 : i32
    %c0_i32_1 = arith.constant 0 : i32
    return %c0_i32, %c0_i32_0 : i32, i32
  }
  func.func @transform_6(%arg0: i32) -> (i32, i32) {
    %c0_i32 = arith.constant 0 : i32
    %c0_i32_0 = arith.constant 0 : i32
    %c0_i32_1 = arith.constant 0 : i32
    return %c0_i32, %c0_i32_0 : i32, i32
  }
  func.func @transform_7(%arg0: i32) -> (i32, i32) {
    %c0_i32 = arith.constant 0 : i32
    %c0_i32_0 = arith.constant 0 : i32
    return %arg0, %c0_i32 : i32, i32
  }
}

</mosaic_0001>

<bundles_post_ra>
// kernel: net_forward.3
= control target key start
LH: loop header
LB: loop body
LE: loop exit
PB: predicated region body
PF: predicated region fallthrough
CT: control target
= control target key end

     0   :  { %v3785_v1 = vmov 0   ;;  %vm416_vm0 = vcmask 1044480   ;;  %vm417_vm1 = vcmask 1045504   ;;  %v3786_v10 = vmov 65535   ;;  %s4954_s0 = inlined_call_operand.vmem [shape: bf16[1,75,1568], index: 0, kind: input, shape index: {}]   ;;  %s4955_s4 = inlined_call_operand.vmem [shape: bf16[6,75], index: 4, kind: input, shape index: {}]   ;;  %s4956_s1 = inlined_call_operand.vmem [shape: bf16[1,75,1568], index: 1, kind: input, shape index: {}]   ;;  %s4957_s2 = inlined_call_operand.vmem [shape: bf16[1,75,1568], index: 2, kind: input, shape index: {}]   ;;  %s4958_s3 = inlined_call_operand.vmem [shape: bf16[1,75,1568], index: 3, kind: input, shape index: {}]   ;;  %s4959_s5 = inlined_call_operand.vmem [shape: f32[6,1], index: 5, kind: input, shape index: {}]   ;;  %s4960_s6 = inlined_call_operand.vmem [shape: bf16[1,6,1568], index: 6, kind: output, shape index: {}]  }
   0x1   :  { %v3404_v0 = vld [vmem:[%s4954_s0 + $0x4] ss:$52 sps:$4 sm:$0xff]   ;;  %491 = vmatprep.mubr.bf16.mxu0 %v3785_v1  ;;  %532 = vmatprep.mubr.bf16.mxu1 %v3785_v1  ;;  %v3406_v2 = vld [vmem:[%s4954_s0 + $0xc] ss:$52 sps:$4 sm:$0xff]   ;;  %v3409_v4 = vld [vmem:[%s4954_s0 + $0x8] ss:$52 sps:$4 sm:$0xff]  }
   0x2   :  { %3403 = vset.pattern.permute.xlu0 %v3785_v1  ;;  %459 = vmatprep.subr.bf16.mxu0 %v3404_v0  ;;  %v3408_v3 = vld [vmem:[%s4954_s0] ss:$52 sps:$4 sm:$0xff]   ;;  %v3414_v7 = vld [vmem:[%s4954_s0 + $0x68] ss:$52 sps:$4 sm:$0xff]   ;;  %v3415_v8 = vld [vmem:[%s4954_s0 + $0x70] ss:$52 sps:$4 sm:$0xff]  }
   0x3   :  { %500 = vmatprep.subr.bf16.mxu1 %v3406_v2  ;;  %v3410_v5 = vld [vmem:[%s4954_s0 + $0x6c] ss:$52 sps:$4 sm:$0xff]   ;;  %460 = vmatpush1.bf16.msra.mxu0 %v3408_v3  ;;  %v3412_v6 = vld [vmem:[%s4954_s0 + $0x74] ss:$52 sps:$4 sm:$0xff]   ;;  %v418_v11 = vsel %vm416_vm0, 4294967295, %v3786_v10  ;;  %vm412_vm2 = vcmask 613376  }
   0x4   :  { %501 = vmatpush1.bf16.msra.mxu1 %v3409_v4  ;;  %461 = vmatprep.subr.bf16.mxu0 %v3410_v5  ;;  %v3416_v9 = vld [vmem:[%s4954_s0 + $0xd4] ss:$52 sps:$4 sm:$0xff]   ;;  %v3418_v12 = vld [vmem:[%s4954_s0 + $0xdc] ss:$52 sps:$4 sm:$0xff]   ;;  %v3421_v14 = vld [vmem:[%s4954_s0 + $0xd8] ss:$52 sps:$4 sm:$0xff]  }
   0x5   :  { %502 = vmatprep.subr.bf16.mxu1 %v3412_v6  ;;  %v3420_v13 = vld [vmem:[%s4954_s0 + $0xd0] ss:$52 sps:$4 sm:$0xff]   ;;  %v3426_v17 = vld [vmem:[%s4954_s0 + $0x138] ss:$52 sps:$4 sm:$0xff]   ;;  %v3427_v18 = vld [vmem:[%s4954_s0 + $0x140] ss:$52 sps:$4 sm:$0xff]  }
   0x6   :  { %v3422_v15 = vld [vmem:[%s4954_s0 + $0x13c] ss:$52 sps:$4 sm:$0xff]   ;;  %v3424_v16 = vld [vmem:[%s4954_s0 + $0x144] ss:$52 sps:$4 sm:$0xff]   ;;  %v3875_v19 = vsel %vm417_vm1, %v418_v11, 0  ;;  %vm3788_vm3 = vmmov 0  }
   0x7   :  { %462 = vmatpush1.bf16.msra.mxu0 %v3414_v7  ;;  %v3428_v20 = vld [vmem:[%s4954_s0 + $0x1a4] ss:$52 sps:$4 sm:$0x3f]   ;;  %v3430_v21 = vld [vmem:[%s4954_s0 + $0x1ac] ss:$52 sps:$4 sm:$0x3f]  }
   0x8   :  { %503 = vmatpush1.bf16.msra.mxu1 %v3415_v8  ;;  %463 = vmatprep.subr.bf16.mxu0 %v3416_v9  ;;  %v424_v22 = vand.u32 %v3428_v20, %v3875_v19  ;;  %v3432_v23 = vld [vmem:[%s4954_s0 + $0x1a0] ss:$52 sps:$4 sm:$0x3f]   ;;  %v3433_v24 = vld [vmem:[%s4954_s0 + $0x1a8] ss:$52 sps:$4 sm:$0x3f]   ;;  %v430_v25 = vand.u32 %v3430_v21, %v3875_v19 }
   0x9   :  { %504 = vmatprep.subr.bf16.mxu1 %v3418_v12  ;;  %v421_v26 = vand.u32 %v3432_v23, %v3875_v19  ;;  %v427_v27 = vand.u32 %v3433_v24, %v3875_v19  ;;  %v3436_v28 = vld [vmem:[%s4954_s0 + $0x14] ss:$52 sps:$4 sm:$0xff]   ;;  %v3439_v29 = vld [vmem:[%s4954_s0 + $0x1c] ss:$52 sps:$4 sm:$0xff]   ;;  %v3902_v30 = vld [vmem:[%s4955_s4] sm:$0x7] }
   0xa   :  { %v3434_v31 = vld [vmem:[%s4954_s0 + $0x10] ss:$52 sps:$4 sm:$0xff]   ;;  %v3437_v32 = vld [vmem:[%s4954_s0 + $0x18] ss:$52 sps:$4 sm:$0xff]   ;;  %v3443_v36 = vld [vmem:[%s4954_s0 + $0x80] ss:$52 sps:$4 sm:$0xff]  }
   0xb   :  { %464 = vmatpush1.bf16.msra.mxu0 %v3420_v13  ;;  %v3442_v33 = vld [vmem:[%s4954_s0 + $0x7c] ss:$52 sps:$4 sm:$0xff]   ;;  %v3445_v34 = vld [vmem:[%s4954_s0 + $0x84] ss:$52 sps:$4 sm:$0xff]   ;;  %v3451_v38 = vld [vmem:[%s4954_s0 + $0xec] ss:$52 sps:$4 sm:$0xff]  }
   0xc   :  { %505 = vmatpush1.bf16.msra.mxu1 %v3421_v14  ;;  %465 = vmatprep.subr.bf16.mxu0 %v3422_v15  ;;  %v3440_v35 = vld [vmem:[%s4954_s0 + $0x78] ss:$52 sps:$4 sm:$0xff]   ;;  %v3446_v39 = vld [vmem:[%s4954_s0 + $0xe0] ss:$52 sps:$4 sm:$0xff]   ;;  %v3449_v40 = vld [vmem:[%s4954_s0 + $0xe8] ss:$52 sps:$4 sm:$0xff]  }
   0xd   :  { %506 = vmatprep.subr.bf16.mxu1 %v3424_v16  ;;  %v3448_v37 = vld [vmem:[%s4954_s0 + $0xe4] ss:$52 sps:$4 sm:$0xff]   ;;  %v3454_v41 = vld [vmem:[%s4954_s0 + $0x14c] ss:$52 sps:$4 sm:$0xff]   ;;  %v3457_v42 = vld [vmem:[%s4954_s0 + $0x154] ss:$52 sps:$4 sm:$0xff]  }
   0xe   :  { %v3460_v43 = vld [vmem:[%s4954_s0 + $0x1b4] ss:$52 sps:$4 sm:$0x3f]   ;;  %v3463_v44 = vld [vmem:[%s4954_s0 + $0x1bc] ss:$52 sps:$4 sm:$0x3f]  }
   0xf   :  { %466 = vmatpush1.bf16.msra.mxu0 %v3426_v17  ;;  %v3452_v45 = vld [vmem:[%s4954_s0 + $0x148] ss:$52 sps:$4 sm:$0xff]   ;;  %v3458_v46 = vld [vmem:[%s4954_s0 + $0x1b0] ss:$52 sps:$4 sm:$0x3f]   ;;  %v436_v49 = vand.u32 %v3460_v43, %v3875_v19  ;;  %v442_v50 = vand.u32 %v3463_v44, %v3875_v19  ;;  %v3787_v17 = vmov 0.0  }
  0x10   :  { %507 = vmatpush1.bf16.msra.mxu1 %v3427_v18  ;;  %467 = vmatprep.subr.bf16.mxu0 %v424_v22  ;;  %v3455_v47 = vld [vmem:[%s4954_s0 + $0x150] ss:$52 sps:$4 sm:$0xff]   ;;  %v3461_v48 = vld [vmem:[%s4954_s0 + $0x1b8] ss:$52 sps:$4 sm:$0x3f]   ;;  %v433_v51 = vand.u32 %v3458_v46, %v3875_v19  ;;  %vm3011_vm4 = vcmask 256000  }
  0x11   :  { %508 = vmatprep.subr.bf16.mxu1 %v430_v25  ;;  %v439_v52 = vand.u32 %v3461_v48, %v3875_v19  ;;  %v3466_v53 = vld [vmem:[%s4954_s0 + $0x24] ss:$52 sps:$4 sm:$0xff]   ;;  %v3469_v54 = vld [vmem:[%s4954_s0 + $0x2c] ss:$52 sps:$4 sm:$0xff]   ;;  %v3467_v56 = vld [vmem:[%s4954_s0 + $0x28] ss:$52 sps:$4 sm:$0xff]  }
  0x12   :  { %v3464_v55 = vld [vmem:[%s4954_s0 + $0x20] ss:$52 sps:$4 sm:$0xff]   ;;  %v3470_v59 = vld [vmem:[%s4954_s0 + $0x88] ss:$52 sps:$4 sm:$0xff]   ;;  %v3473_v60 = vld [vmem:[%s4954_s0 + $0x90] ss:$52 sps:$4 sm:$0xff]  }
  0x13   :  { %468 = vmatpush1.bf16.msra.mxu0 %v421_v26  ;;  %v3472_v57 = vld [vmem:[%s4954_s0 + $0x8c] ss:$52 sps:$4 sm:$0xff]   ;;  %v3475_v58 = vld [vmem:[%s4954_s0 + $0x94] ss:$52 sps:$4 sm:$0xff]   ;;  %v3481_v62 = vld [vmem:[%s4954_s0 + $0xfc] ss:$52 sps:$4 sm:$0xff]  }
  0x14   :  { %509 = vmatpush1.bf16.msra.mxu1 %v427_v27  ;;  %541 = vmatprep.subr.bf16.mxu0 %v3436_v28  ;;  %v3478_v61 = vld [vmem:[%s4954_s0 + $0xf4] ss:$52 sps:$4 sm:$0xff]   ;;  %v3476_v63 = vld [vmem:[%s4954_s0 + $0xf0] ss:$52 sps:$4 sm:$0xff]   ;;  %v3479_v0 = vld [vmem:[%s4954_s0 + $0xf8] ss:$52 sps:$4 sm:$0xff]  }
  0x15   :  { %582 = vmatprep.subr.bf16.mxu1 %v3439_v29  ;;  %v3484_v2 = vld [vmem:[%s4954_s0 + $0x15c] ss:$52 sps:$4 sm:$0xff]   ;;  %v3487_v3 = vld [vmem:[%s4954_s0 + $0x164] ss:$52 sps:$4 sm:$0xff]   ;;  %v3485_v7 = vld [vmem:[%s4954_s0 + $0x160] ss:$52 sps:$4 sm:$0xff]  }
  0x16   :  { %3082 = vmatmul.mubr.msk.bf16.vlgmr.msra.gmra.mrb[0].mxu0 %vm412_vm2, %v3902_v30  ;;  %v3490_v4 = vld [vmem:[%s4954_s0 + $0x1c4] ss:$52 sps:$4 sm:$0x3f]   ;;  %v3493_v5 = vld [vmem:[%s4954_s0 + $0x1cc] ss:$52 sps:$4 sm:$0x3f]  }
  0x17   :  { %3083 = vmatmul.mubr.msk.bf16.vlgmr.msra.gmra.mrb[0].mxu1 %vm412_vm2, %v3902_v30  ;;  %542 = vmatpush1.bf16.msra.mxu0 %v3434_v31  ;;  %v3482_v6 = vld [vmem:[%s4954_s0 + $0x158] ss:$52 sps:$4 sm:$0xff]   ;;  %v3488_v8 = vld [vmem:[%s4954_s0 + $0x1c0] ss:$52 sps:$4 sm:$0x3f]   ;;  %v448_v10 = vand.u32 %v3490_v4, %v3875_v19  ;;  %v454_v11 = vand.u32 %v3493_v5, %v3875_v19 }
  0x18   :  { %583 = vmatpush1.bf16.msra.mxu1 %v3437_v32  ;;  %543 = vmatprep.subr.bf16.mxu0 %v3442_v33  ;;  %v3491_v9 = vld [vmem:[%s4954_s0 + $0x1c8] ss:$52 sps:$4 sm:$0x3f]   ;;  %v445_v12 = vand.u32 %v3488_v8, %v3875_v19  ;;  %v3496_v14 = vld [vmem:[%s4956_s1 + $0x4] ss:$52 sps:$4 sm:$0xff]  }
  0x19   :  { %584 = vmatprep.subr.bf16.mxu1 %v3445_v34  ;;  %573 = vmatprep.mubr.bf16.mxu0 %v3785_v1  ;;  %v451_v13 = vand.u32 %v3491_v9, %v3875_v19  ;;  %v3494_v15 = vld [vmem:[%s4956_s1] ss:$52 sps:$4 sm:$0xff]   ;;  %v3497_v16 = vld [vmem:[%s4954_s0 + $0x30] ss:$52 sps:$4 sm:$0xff]   ;;  %v3498_v20 = vld [vmem:[%s4956_s1 + $0x68] ss:$52 sps:$4 sm:$0xff]  }
  0x1a   :  { %614 = vmatprep.mubr.bf16.mxu1 %v3785_v1  ;;  %v3500_v18 = vld [vmem:[%s4956_s1 + $0x6c] ss:$52 sps:$4 sm:$0xff]   ;;  %v3504_v22 = vld [vmem:[%s4956_s1 + $0xd4] ss:$52 sps:$4 sm:$0xff]   ;;  %v3502_v23 = vld [vmem:[%s4956_s1 + $0xd0] ss:$52 sps:$4 sm:$0xff]  }
  0x1b   :  { %544 = vmatpush1.bf16.msra.mxu0 %v3440_v35  ;;  %v3501_v21 = vld [vmem:[%s4954_s0 + $0x98] ss:$52 sps:$4 sm:$0xff]   ;;  %v3505_v24 = vld [vmem:[%s4954_s0 + $0x100] ss:$52 sps:$4 sm:$0xff]   ;;  %v3508_v25 = vld [vmem:[%s4956_s1 + $0x13c] ss:$52 sps:$4 sm:$0xff]  }
  0x1c   :  { %585 = vmatpush1.bf16.msra.mxu1 %v3443_v36  ;;  %545 = vmatprep.subr.bf16.mxu0 %v3448_v37  ;;  %v3512_v26 = vld [vmem:[%s4956_s1 + $0x1a4] ss:$52 sps:$4 sm:$0x3f]   ;;  %v3509_v28 = vld [vmem:[%s4954_s0 + $0x168] ss:$52 sps:$4 sm:$0xff]  }
  0x1d   :  { %586 = vmatprep.subr.bf16.mxu1 %v3451_v38  ;;  %v3506_v27 = vld [vmem:[%s4956_s1 + $0x138] ss:$52 sps:$4 sm:$0xff]   ;;  %v3510_v29 = vld [vmem:[%s4956_s1 + $0x1a0] ss:$52 sps:$4 sm:$0x3f]   ;;  %v1136_v32 = vand.u32 %v3512_v26, %v3875_v19 }
  0x1e   :  { %v3513_v31 = vld [vmem:[%s4954_s0 + $0x1d0] ss:$52 sps:$4 sm:$0x3f]   ;;  %v1133_v34 = vand.u32 %v3510_v29, %v3875_v19  ;;  %v3516_v35 = vld [vmem:[%s4956_s1 + $0xc] ss:$52 sps:$4 sm:$0xff]  }
  0x1f   :  { %546 = vmatpush1.bf16.msra.mxu0 %v3446_v39  ;;  %v457_v33 = vand.u32 %v3513_v31, %v3875_v19  ;;  %v3519_v36 = vld [vmem:[%s4956_s1 + $0x14] ss:$52 sps:$4 sm:$0xff]   ;;  %v3517_v38 = vld [vmem:[%s4956_s1 + $0x10] ss:$52 sps:$4 sm:$0xff]   ;;  %v3537_v48 = vld [vmem:[%s4956_s1 + $0x14c] ss:$52 sps:$4 sm:$0xff]  }
  0x20   :  { %587 = vmatpush1.bf16.msra.mxu1 %v3449_v40  ;;  %547 = vmatprep.subr.bf16.mxu0 %v3454_v41  ;;  %v3514_v37 = vld [vmem:[%s4956_s1 + $0x8] ss:$52 sps:$4 sm:$0xff]   ;;  %v3520_v41 = vld [vmem:[%s4956_s1 + $0x70] ss:$52 sps:$4 sm:$0xff]   ;;  %v3529_v46 = vld [vmem:[%s4956_s1 + $0xe0] ss:$52 sps:$4 sm:$0xff]  }
  0x21   :  { %588 = vmatprep.subr.bf16.mxu1 %v3457_v42  ;;  %v3522_v39 = vld [vmem:[%s4956_s1 + $0x74] ss:$52 sps:$4 sm:$0xff]   ;;  %v3525_v40 = vld [vmem:[%s4956_s1 + $0x7c] ss:$52 sps:$4 sm:$0xff]   ;;  %v3523_v42 = vld [vmem:[%s4956_s1 + $0x78] ss:$52 sps:$4 sm:$0xff]  }
  0x22   :  { %v3528_v43 = vld [vmem:[%s4956_s1 + $0xdc] ss:$52 sps:$4 sm:$0xff]   ;;  %v3531_v44 = vld [vmem:[%s4956_s1 + $0xe4] ss:$52 sps:$4 sm:$0xff]   ;;  %v3558_v4 = vld [vmem:[%s4956_s1 + $0xec] ss:$52 sps:$4 sm:$0xff]  }
  0x23   :  { %548 = vmatpush1.bf16.msra.mxu0 %v3452_v45  ;;  %v3526_v45 = vld [vmem:[%s4956_s1 + $0xd8] ss:$52 sps:$4 sm:$0xff]   ;;  %v3561_v5 = vld [vmem:[%s4956_s1 + $0xf4] ss:$52 sps:$4 sm:$0xff]   ;;  %v3578_v26 = vld [vmem:[%s4956_s1 + $0x90] ss:$52 sps:$4 sm:$0xff]  }
  0x24   :  { %589 = vmatpush1.bf16.msra.mxu1 %v3455_v47  ;;  %549 = vmatprep.subr.bf16.mxu0 %v436_v49  ;;  %v3534_v47 = vld [vmem:[%s4956_s1 + $0x144] ss:$52 sps:$4 sm:$0xff]   ;;  %v3540_v49 = vld [vmem:[%s4956_s1 + $0x1ac] ss:$52 sps:$4 sm:$0x3f]  }
  0x25   :  { %590 = vmatprep.subr.bf16.mxu1 %v442_v50  ;;  %v3543_v50 = vld [vmem:[%s4956_s1 + $0x1b4] ss:$52 sps:$4 sm:$0x3f]   ;;  %v3570_v9 = vld [vmem:[%s4956_s1 + $0x1bc] ss:$52 sps:$4 sm:$0x3f]  }
  0x26   :  { %v3564_v8 = vld [vmem:[%s4956_s1 + $0x154] ss:$52 sps:$4 sm:$0xff]   ;;  %v3582_v29 = vld [vmem:[%s4956_s1 + $0xf8] ss:$52 sps:$4 sm:$0xff]  }
  0x27   :  { %550 = vmatpush1.bf16.msra.mxu0 %v433_v51  ;;  %v3532_v51 = vld [vmem:[%s4956_s1 + $0x140] ss:$52 sps:$4 sm:$0xff]  }
  0x28   :  { %591 = vmatpush1.bf16.msra.mxu1 %v439_v52  ;;  %623 = vmatprep.subr.bf16.mxu0 %v3466_v53  ;;  %v3535_v52 = vld [vmem:[%s4956_s1 + $0x148] ss:$52 sps:$4 sm:$0xff]   ;;  %v3585_v31 = vld [vmem:[%s4956_s1 + $0x100] ss:$52 sps:$4 sm:$0xff]  }
  0x29   :  { %664 = vmatprep.subr.bf16.mxu1 %v3469_v54  ;;  %v3538_v53 = vld [vmem:[%s4956_s1 + $0x1a8] ss:$52 sps:$4 sm:$0x3f]   ;;  %v3541_v54 = vld [vmem:[%s4956_s1 + $0x1b0] ss:$52 sps:$4 sm:$0x3f]  }
  0x2a   :  { %3084 = vmatmul.mubr.msk.bf16.vlgmr.msra.gmra.mrb[4].mxu0 %vm412_vm2, %v3902_v30 }
  0x2b   :  { %3085 = vmatmul.mubr.msk.bf16.vlgmr.msra.gmra.mrb[4].mxu1 %vm412_vm2, %v3902_v30  ;;  %624 = vmatpush1.bf16.msra.mxu0 %v3464_v55  ;;  %v1142_v55 = vand.u32 %v3540_v49, %v3875_v19  ;;  %v3608_v49 = vld [vmem:[%s4957_s2 + $0xd4] ss:$52 sps:$4 sm:$0xff]  }
  0x2c   :  { %665 = vmatpush1.bf16.msra.mxu1 %v3467_v56  ;;  %625 = vmatprep.subr.bf16.mxu0 %v3472_v57  ;;  %v1148_v56 = vand.u32 %v3543_v50, %v3875_v19  ;;  %v1139_v57 = vand.u32 %v3538_v53, %v3875_v19  ;;  %v3606_v50 = vld [vmem:[%s4957_s2 + $0xd0] ss:$52 sps:$4 sm:$0xff]  }
  0x2d   :  { %666 = vmatprep.subr.bf16.mxu1 %v3475_v58  ;;  %655 = vmatprep.mubr.bf16.mxu0 %v3785_v1  ;;  %v1145_v58 = vand.u32 %v3541_v54, %v3875_v19  ;;  %v3617_v53 = vld [vmem:[%s4957_s2 + $0x144] ss:$52 sps:$4 sm:$0xff]  }
  0x2e   :  { %696 = vmatprep.mubr.bf16.mxu1 %v3785_v1  ;;  %v3620_v54 = vld [vmem:[%s4957_s2 + $0x1a4] ss:$52 sps:$4 sm:$0x3f]  }
  0x2f   :  { %626 = vmatpush1.bf16.msra.mxu0 %v3470_v59  ;;  %v3546_v59 = vld [vmem:[%s4956_s1 + $0x1c] ss:$52 sps:$4 sm:$0xff]  }
  0x30   :  { %667 = vmatpush1.bf16.msra.mxu1 %v3473_v60  ;;  %627 = vmatprep.subr.bf16.mxu0 %v3478_v61  ;;  %v3549_v60 = vld [vmem:[%s4956_s1 + $0x24] ss:$52 sps:$4 sm:$0xff]  }
  0x31   :  { %668 = vmatprep.subr.bf16.mxu1 %v3481_v62  ;;  %v3544_v61 = vld [vmem:[%s4956_s1 + $0x18] ss:$52 sps:$4 sm:$0xff]   ;;  %v3547_v62 = vld [vmem:[%s4956_s1 + $0x20] ss:$52 sps:$4 sm:$0xff]  }
  0x33   :  { %628 = vmatpush1.bf16.msra.mxu0 %v3476_v63  ;;  %v3552_v63 = vld [vmem:[%s4956_s1 + $0x84] ss:$52 sps:$4 sm:$0xff]  }
  0x34   :  { %669 = vmatpush1.bf16.msra.mxu1 %v3479_v0  ;;  %629 = vmatprep.subr.bf16.mxu0 %v3484_v2  ;;  %v3555_v0 = vld [vmem:[%s4956_s1 + $0x8c] ss:$52 sps:$4 sm:$0xff]  }
  0x35   :  { %670 = vmatprep.subr.bf16.mxu1 %v3487_v3  ;;  %v3550_v2 = vld [vmem:[%s4956_s1 + $0x80] ss:$52 sps:$4 sm:$0xff]   ;;  %v3553_v3 = vld [vmem:[%s4956_s1 + $0x88] ss:$52 sps:$4 sm:$0xff]  }
  0x37   :  { %630 = vmatpush1.bf16.msra.mxu0 %v3482_v6  ;;  %v3556_v6 = vld [vmem:[%s4956_s1 + $0xe8] ss:$52 sps:$4 sm:$0xff]  }
  0x38   :  { %671 = vmatpush1.bf16.msra.mxu1 %v3485_v7  ;;  %631 = vmatprep.subr.bf16.mxu0 %v448_v10  ;;  %v3559_v7 = vld [vmem:[%s4956_s1 + $0xf0] ss:$52 sps:$4 sm:$0xff]  }
  0x39   :  { %672 = vmatprep.subr.bf16.mxu1 %v454_v11  ;;  %v3567_v10 = vld [vmem:[%s4956_s1 + $0x15c] ss:$52 sps:$4 sm:$0xff]   ;;  %v3573_v11 = vld [vmem:[%s4956_s1 + $0x1c4] ss:$52 sps:$4 sm:$0x3f]  }
  0x3b   :  { %632 = vmatpush1.bf16.msra.mxu0 %v445_v12  ;;  %v3562_v12 = vld [vmem:[%s4956_s1 + $0x150] ss:$52 sps:$4 sm:$0xff]  }
  0x3c   :  { %673 = vmatpush1.bf16.msra.mxu1 %v451_v13  ;;  %3343 = vmatprep.subr.bf16.mxu0 %v3787_v17  ;;  %v3565_v13 = vld [vmem:[%s4956_s1 + $0x158] ss:$52 sps:$4 sm:$0xff]  }
  0x3d   :  { %1171 = vmatprep.subr.bf16.mxu1 %v3496_v14  ;;  %v3568_v14 = vld [vmem:[%s4956_s1 + $0x1b8] ss:$52 sps:$4 sm:$0x3f]  }
  0x3e   :  { %3086 = vmatmul.mubr.msk.bf16.vlgmr.msra.gmra.mrb[8].mxu0 %vm412_vm2, %v3902_v30 }
  0x3f   :  { %3087 = vmatmul.mubr.msk.bf16.vlgmr.msra.gmra.mrb[8].mxu1 %vm412_vm2, %v3902_v30  ;;  %3344 = vmatpush3.bf16.msra.mxu0 %v3497_v16  ;;  %v1154_v16 = vand.u32 %v3570_v9, %v3875_v19  ;;  %v3633_v9 = vld [vmem:[%s4957_s2 + $0x80] ss:$52 sps:$4 sm:$0xff]  }
  0x40   :  { %1172 = vmatpush1.bf16.msra.mxu1 %v3494_v15  ;;  %3345 = vmatprep.subr.bf16.mxu0 %v3787_v17  ;;  %v3571_v15 = vld [vmem:[%s4956_s1 + $0x1c0] ss:$52 sps:$4 sm:$0x3f]  }
  0x41   :  { %1173 = vmatprep.subr.bf16.mxu1 %v3500_v18  ;;  %3353 = vmatprep.mubr.msk.bf16.mxu0 %vm3788_vm3, %v3787_v17  ;;  %v1160_v18 = vand.u32 %v3573_v11, %v3875_v19  ;;  %v3641_v11 = vld [vmem:[%s4957_s2 + $0xec] ss:$52 sps:$4 sm:$0xff]  }
  0x42   :  { %1203 = vmatprep.mubr.bf16.mxu1 %v3785_v1 }
  0x43   :  { %3346 = vmatpush3.bf16.msra.mxu0 %v3501_v21  ;;  %v1157_v21 = vand.u32 %v3571_v15, %v3875_v19  ;;  %v3647_v15 = vld [vmem:[%s4957_s2 + $0x154] ss:$52 sps:$4 sm:$0xff]  }
  0x44   :  { %1174 = vmatpush1.bf16.msra.mxu1 %v3498_v20  ;;  %3347 = vmatprep.subr.bf16.mxu0 %v3787_v17  ;;  %v1151_v20 = vand.u32 %v3568_v14, %v3875_v19  ;;  %v3644_v14 = vld [vmem:[%s4957_s2 + $0x14c] ss:$52 sps:$4 sm:$0xff]  }
  0x45   :  { %1175 = vmatprep.subr.bf16.mxu1 %v3504_v22  ;;  %v3576_v22 = vld [vmem:[%s4956_s1 + $0x2c] ss:$52 sps:$4 sm:$0xff]  }
  0x47   :  { %3348 = vmatpush3.bf16.msra.mxu0 %v3505_v24  ;;  %v3577_v24 = vld [vmem:[%s4956_s1 + $0x30] ss:$52 sps:$4 sm:$0xff]  }
  0x48   :  { %1176 = vmatpush1.bf16.msra.mxu1 %v3502_v23  ;;  %3349 = vmatprep.subr.bf16.mxu0 %v3787_v17  ;;  %v3574_v23 = vld [vmem:[%s4956_s1 + $0x28] ss:$52 sps:$4 sm:$0xff]  }
  0x49   :  { %1177 = vmatprep.subr.bf16.mxu1 %v3508_v25  ;;  %v3580_v25 = vld [vmem:[%s4956_s1 + $0x94] ss:$52 sps:$4 sm:$0xff]  }
  0x4b   :  { %3350 = vmatpush3.bf16.msra.mxu0 %v3509_v28  ;;  %v3584_v28 = vld [vmem:[%s4956_s1 + $0xfc] ss:$52 sps:$4 sm:$0xff]  }
  0x4c   :  { %1178 = vmatpush1.bf16.msra.mxu1 %v3506_v27  ;;  %3351 = vmatprep.subr.bf16.mxu0 %v3787_v17  ;;  %v3581_v27 = vld [vmem:[%s4956_s1 + $0x98] ss:$52 sps:$4 sm:$0xff]  }
  0x4d   :  { %1179 = vmatprep.subr.bf16.mxu1 %v1136_v32  ;;  %v3588_v32 = vld [vmem:[%s4956_s1 + $0x164] ss:$52 sps:$4 sm:$0xff]  }
  0x4f   :  { %3352 = vmatpush3.bf16.msra.mxu0 %v457_v33  ;;  %v3592_v33 = vld [vmem:[%s4956_s1 + $0x1cc] ss:$52 sps:$4 sm:$0x3f]  }
  0x50   :  { %1180 = vmatpush1.bf16.msra.mxu1 %v1133_v34  ;;  %1212 = vmatprep.subr.bf16.mxu0 %v3516_v35  ;;  %v3586_v34 = vld [vmem:[%s4956_s1 + $0x160] ss:$52 sps:$4 sm:$0xff]   ;;  %v3589_v35 = vld [vmem:[%s4956_s1 + $0x168] ss:$52 sps:$4 sm:$0xff]  }
  0x51   :  { %1253 = vmatprep.subr.bf16.mxu1 %v3519_v36  ;;  %v3590_v36 = vld [vmem:[%s4956_s1 + $0x1c8] ss:$52 sps:$4 sm:$0x3f]  }
  0x52   :  { %3354 = vmatmul.mubr.msk.bf16.vlgmr.msra.gmra.mrb[12].mxu0 %vm412_vm2, %v3902_v30 }
  0x53   :  { %3154 = vmatmul.mubr.msk.bf16.vlgmr.msra.gmra.mrb[12].mxu1 %vm412_vm2, %v3902_v30  ;;  %1213 = vmatpush1.bf16.msra.mxu0 %v3514_v37  ;;  %v3593_v37 = vld [vmem:[%s4956_s1 + $0x1d0] ss:$52 sps:$4 sm:$0x3f]  }
  0x54   :  { %1254 = vmatpush1.bf16.msra.mxu1 %v3517_v38  ;;  %1214 = vmatprep.subr.bf16.mxu0 %v3522_v39  ;;  %v1166_v38 = vand.u32 %v3592_v33, %v3875_v19  ;;  %v1163_v39 = vand.u32 %v3590_v36, %v3875_v19  ;;  %v3662_v33 = vld [vmem:[%s4957_s2 + $0x8c] ss:$52 sps:$4 sm:$0xff]   ;;  %v3663_v36 = vld [vmem:[%s4957_s2 + $0x90] ss:$52 sps:$4 sm:$0xff]  }
  0x55   :  { %1255 = vmatprep.subr.bf16.mxu1 %v3525_v40  ;;  %1244 = vmatprep.mubr.bf16.mxu0 %v3785_v1  ;;  %v1169_v40 = vand.u32 %v3593_v37, %v3875_v19  ;;  %v3668_v37 = vld [vmem:[%s4957_s2 + $0xf4] ss:$52 sps:$4 sm:$0xff]  }
  0x56   :  { %1285 = vmatprep.mubr.bf16.mxu1 %v3785_v1 }
  0x57   :  { %1215 = vmatpush1.bf16.msra.mxu0 %v3520_v41  ;;  %v3596_v41 = vld [vmem:[%s4957_s2 + $0x4] ss:$52 sps:$4 sm:$0xff]  }
  0x58   :  { %1256 = vmatpush1.bf16.msra.mxu1 %v3523_v42  ;;  %1216 = vmatprep.subr.bf16.mxu0 %v3528_v43  ;;  %v3599_v42 = vld [vmem:[%s4957_s2 + $0xc] ss:$52 sps:$4 sm:$0xff]  }
  0x59   :  { %1257 = vmatprep.subr.bf16.mxu1 %v3531_v44  ;;  %v3594_v43 = vld [vmem:[%s4957_s2] ss:$52 sps:$4 sm:$0xff]   ;;  %v3597_v44 = vld [vmem:[%s4957_s2 + $0x8] ss:$52 sps:$4 sm:$0xff]  }
  0x5b   :  { %1217 = vmatpush1.bf16.msra.mxu0 %v3526_v45  ;;  %v3602_v45 = vld [vmem:[%s4957_s2 + $0x6c] ss:$52 sps:$4 sm:$0xff]  }
  0x5c   :  { %1258 = vmatpush1.bf16.msra.mxu1 %v3529_v46  ;;  %1218 = vmatprep.subr.bf16.mxu0 %v3534_v47  ;;  %v3605_v46 = vld [vmem:[%s4957_s2 + $0x74] ss:$52 sps:$4 sm:$0xff]  }
  0x5d   :  { %1259 = vmatprep.subr.bf16.mxu1 %v3537_v48  ;;  %v3600_v47 = vld [vmem:[%s4957_s2 + $0x68] ss:$52 sps:$4 sm:$0xff]   ;;  %v3603_v48 = vld [vmem:[%s4957_s2 + $0x70] ss:$52 sps:$4 sm:$0xff]  }
  0x5f   :  { %1219 = vmatpush1.bf16.msra.mxu0 %v3532_v51  ;;  %v3609_v51 = vld [vmem:[%s4957_s2 + $0xd8] ss:$52 sps:$4 sm:$0xff]  }
  0x60   :  { %1260 = vmatpush1.bf16.msra.mxu1 %v3535_v52  ;;  %1220 = vmatprep.subr.bf16.mxu0 %v1142_v55  ;;  %v3614_v52 = vld [vmem:[%s4957_s2 + $0x13c] ss:$52 sps:$4 sm:$0xff]   ;;  %v3623_v55 = vld [vmem:[%s4957_s2 + $0x1ac] ss:$52 sps:$4 sm:$0x3f]  }
  0x61   :  { %1261 = vmatprep.subr.bf16.mxu1 %v1148_v56  ;;  %v3612_v56 = vld [vmem:[%s4957_s2 + $0x138] ss:$52 sps:$4 sm:$0xff]  }
  0x63   :  { %1221 = vmatpush1.bf16.msra.mxu0 %v1139_v57  ;;  %v3618_v57 = vld [vmem:[%s4957_s2 + $0x1a0] ss:$52 sps:$4 sm:$0x3f]  }
  0x64   :  { %1262 = vmatpush1.bf16.msra.mxu1 %v1145_v58  ;;  %1294 = vmatprep.subr.bf16.mxu0 %v3546_v59  ;;  %v3615_v58 = vld [vmem:[%s4957_s2 + $0x140] ss:$52 sps:$4 sm:$0xff]   ;;  %v3621_v59 = vld [vmem:[%s4957_s2 + $0x1a8] ss:$52 sps:$4 sm:$0x3f]  }
  0x65   :  { %1335 = vmatprep.subr.bf16.mxu1 %v3549_v60  ;;  %v1861_v60 = vand.u32 %v3620_v54, %v3875_v19  ;;  %v3684_v54 = vld [vmem:[%s4958_s3] ss:$52 sps:$4 sm:$0xff]  }
  0x66   :  { %3155 = vmatmul.mubr.msk.bf16.vlgmr.msra.gmra.mrb[16].mxu0 %vm412_vm2, %v3902_v30 }
  0x67   :  { %3156 = vmatmul.mubr.msk.bf16.vlgmr.msra.gmra.mrb[16].mxu1 %vm412_vm2, %v3902_v30  ;;  %1295 = vmatpush1.bf16.msra.mxu0 %v3544_v61  ;;  %v1867_v61 = vand.u32 %v3623_v55, %v3875_v19  ;;  %v3687_v55 = vld [vmem:[%s4957_s2 + $0x30] ss:$52 sps:$4 sm:$0xff]  }
  0x68   :  { %1336 = vmatpush1.bf16.msra.mxu1 %v3547_v62  ;;  %1296 = vmatprep.subr.bf16.mxu0 %v3552_v63  ;;  %v1858_v62 = vand.u32 %v3618_v57, %v3875_v19  ;;  %v1864_v63 = vand.u32 %v3621_v59, %v3875_v19  ;;  %v3688_v57 = vld [vmem:[%s4958_s3 + $0x68] ss:$52 sps:$4 sm:$0xff]  }
  0x69   :  { %1337 = vmatprep.subr.bf16.mxu1 %v3555_v0  ;;  %1326 = vmatprep.mubr.bf16.mxu0 %v3785_v1  ;;  %v3626_v0 = vld [vmem:[%s4957_s2 + $0x14] ss:$52 sps:$4 sm:$0xff]  }
  0x6a   :  { %1367 = vmatprep.mubr.bf16.mxu1 %v3785_v1  ;;  %v3694_v59 = vld [vmem:[%s4958_s3 + $0xd4] ss:$52 sps:$4 sm:$0xff]  }
  0x6b   :  { %1297 = vmatpush1.bf16.msra.mxu0 %v3550_v2  ;;  %v3629_v2 = vld [vmem:[%s4957_s2 + $0x1c] ss:$52 sps:$4 sm:$0xff]  }
  0x6c   :  { %1338 = vmatpush1.bf16.msra.mxu1 %v3553_v3  ;;  %1298 = vmatprep.subr.bf16.mxu0 %v3558_v4  ;;  %v3624_v3 = vld [vmem:[%s4957_s2 + $0x10] ss:$52 sps:$4 sm:$0xff]   ;;  %v3627_v4 = vld [vmem:[%s4957_s2 + $0x18] ss:$52 sps:$4 sm:$0xff]  }
  0x6d   :  { %1339 = vmatprep.subr.bf16.mxu1 %v3561_v5  ;;  %v3632_v5 = vld [vmem:[%s4957_s2 + $0x7c] ss:$52 sps:$4 sm:$0xff]  }
  0x6f   :  { %1299 = vmatpush1.bf16.msra.mxu0 %v3556_v6  ;;  %v3635_v6 = vld [vmem:[%s4957_s2 + $0x84] ss:$52 sps:$4 sm:$0xff]  }
  0x70   :  { %1340 = vmatpush1.bf16.msra.mxu1 %v3559_v7  ;;  %1300 = vmatprep.subr.bf16.mxu0 %v3564_v8  ;;  %v4389_v7 = vld [vmem:[%s4955_s4] sm:$0x7]  ;;  %v3630_v8 = vld [vmem:[%s4957_s2 + $0x78] ss:$52 sps:$4 sm:$0xff]  }
  0x71   :  { %1341 = vmatprep.subr.bf16.mxu1 %v3567_v10  ;;  %v3638_v10 = vld [vmem:[%s4957_s2 + $0xe4] ss:$52 sps:$4 sm:$0xff]  }
  0x73   :  { %1301 = vmatpush1.bf16.msra.mxu0 %v3562_v12  ;;  %v3636_v12 = vld [vmem:[%s4957_s2 + $0xe0] ss:$52 sps:$4 sm:$0xff]  }
  0x74   :  { %1342 = vmatpush1.bf16.msra.mxu1 %v3565_v13  ;;  %1302 = vmatprep.subr.bf16.mxu0 %v1154_v16  ;;  %v3639_v13 = vld [vmem:[%s4957_s2 + $0xe8] ss:$52 sps:$4 sm:$0xff]  }
  0x75   :  { %1343 = vmatprep.subr.bf16.mxu1 %v1160_v18  ;;  %v3650_v16 = vld [vmem:[%s4957_s2 + $0x1b4] ss:$52 sps:$4 sm:$0x3f]   ;;  %v3653_v18 = vld [vmem:[%s4957_s2 + $0x1bc] ss:$52 sps:$4 sm:$0x3f]  }
  0x77   :  { %1303 = vmatpush1.bf16.msra.mxu0 %v1151_v20  ;;  %v3642_v20 = vld [vmem:[%s4957_s2 + $0x148] ss:$52 sps:$4 sm:$0xff]  }
  0x78   :  { %1344 = vmatpush1.bf16.msra.mxu1 %v1157_v21  ;;  %1376 = vmatprep.subr.bf16.mxu0 %v3576_v22  ;;  %v3645_v21 = vld [vmem:[%s4957_s2 + $0x150] ss:$52 sps:$4 sm:$0xff]  }
  0x79   :  { %3357 = vmatprep.subr.bf16.mxu1 %v3787_v17  ;;  %v3648_v22 = vld [vmem:[%s4957_s2 + $0x1b0] ss:$52 sps:$4 sm:$0x3f]  }
  0x7a   :  { %3157 = vmatmul.mubr.msk.bf16.vlgmr.msra.gmra.mrb[20].mxu0 %vm412_vm2, %v3902_v30 }
  0x7b   :  { %3158 = vmatmul.mubr.msk.bf16.vlgmr.msra.gmra.mrb[20].mxu1 %vm412_vm2, %v3902_v30  ;;  %1377 = vmatpush1.bf16.msra.mxu0 %v3574_v23  ;;  %v3651_v23 = vld [vmem:[%s4957_s2 + $0x1b8] ss:$52 sps:$4 sm:$0x3f]  }
  0x7c   :  { %3358 = vmatpush3.bf16.msra.mxu1 %v3577_v24  ;;  %1378 = vmatprep.subr.bf16.mxu0 %v3580_v25  ;;  %v1873_v24 = vand.u32 %v3650_v16, %v3875_v19  ;;  %v1879_v25 = vand.u32 %v3653_v18, %v3875_v19  ;;  %v3713_v16 = vld [vmem:[%s4958_s3 + $0x78] ss:$52 sps:$4 sm:$0xff]   ;;  %v3718_v18 = vld [vmem:[%s4958_s3 + $0xdc] ss:$52 sps:$4 sm:$0xff]  }
  0x7d   :  { %3359 = vmatprep.subr.bf16.mxu1 %v3787_v17  ;;  %1408 = vmatprep.mubr.bf16.mxu0 %v3785_v1 }
  0x7e   :  { %3367 = vmatprep.mubr.msk.bf16.mxu1 %vm3788_vm3, %v3787_v17 }
  0x7f   :  { %1379 = vmatpush1.bf16.msra.mxu0 %v3578_v26  ;;  %v1870_v26 = vand.u32 %v3648_v22, %v3875_v19  ;;  %v3719_v22 = vld [vmem:[%s4958_s3 + $0xe0] ss:$52 sps:$4 sm:$0xff]  }
  0x80   :  { %3360 = vmatpush3.bf16.msra.mxu1 %v3581_v27  ;;  %1380 = vmatprep.subr.bf16.mxu0 %v3584_v28  ;;  %v1876_v27 = vand.u32 %v3651_v23, %v3875_v19  ;;  %v3656_v28 = vld [vmem:[%s4957_s2 + $0x24] ss:$52 sps:$4 sm:$0xff]  }
  0x81   :  { %3361 = vmatprep.subr.bf16.mxu1 %v3787_v17  ;;  %v3724_v23 = vld [vmem:[%s4958_s3 + $0x144] ss:$52 sps:$4 sm:$0xff]  }
  0x83   :  { %1381 = vmatpush1.bf16.msra.mxu0 %v3582_v29  ;;  %v3659_v29 = vld [vmem:[%s4957_s2 + $0x2c] ss:$52 sps:$4 sm:$0xff]  }
  0x84   :  { %3362 = vmatpush3.bf16.msra.mxu1 %v3585_v31  ;;  %1382 = vmatprep.subr.bf16.mxu0 %v3588_v32  ;;  %v3654_v31 = vld [vmem:[%s4957_s2 + $0x20] ss:$52 sps:$4 sm:$0xff]   ;;  %v3657_v32 = vld [vmem:[%s4957_s2 + $0x28] ss:$52 sps:$4 sm:$0xff]  }
  0x85   :  { %3363 = vmatprep.subr.bf16.mxu1 %v3787_v17 }
  0x87   :  { %1383 = vmatpush1.bf16.msra.mxu0 %v3586_v34  ;;  %v3665_v34 = vld [vmem:[%s4957_s2 + $0x94] ss:$52 sps:$4 sm:$0xff]  }
  0x88   :  { %3364 = vmatpush3.bf16.msra.mxu1 %v3589_v35  ;;  %1384 = vmatprep.subr.bf16.mxu0 %v1166_v38  ;;  %v3660_v35 = vld [vmem:[%s4957_s2 + $0x88] ss:$52 sps:$4 sm:$0xff]  }
  0x89   :  { %3365 = vmatprep.subr.bf16.mxu1 %v3787_v17  ;;  %v3671_v38 = vld [vmem:[%s4957_s2 + $0xfc] ss:$52 sps:$4 sm:$0xff]  }
  0x8b   :  { %1385 = vmatpush1.bf16.msra.mxu0 %v1163_v39  ;;  %v2920_v39 = vld [vmem:[%s4959_s5] sm:$0x3f] }
  0x8c   :  { %3366 = vmatpush3.bf16.msra.mxu1 %v1169_v40  ;;  %1896 = vmatprep.subr.bf16.mxu0 %v3596_v41  ;;  %v3666_v40 = vld [vmem:[%s4957_s2 + $0xf0] ss:$52 sps:$4 sm:$0xff]   ;;  %v3669_v41 = vld [vmem:[%s4957_s2 + $0xf8] ss:$52 sps:$4 sm:$0xff]  }
  0x8d   :  { %1937 = vmatprep.subr.bf16.mxu1 %v3599_v42  ;;  %2923 = vperm.xlu0 %3403, %v2920_v39   ;;  %v3674_v42 = vld [vmem:[%s4957_s2 + $0x15c] ss:$52 sps:$4 sm:$0xff]  }
  0x8e   :  { %3159 = vmatmul.mubr.msk.bf16.vlgmr.msra.gmra.mrb[24].mxu0 %vm412_vm2, %v3902_v30 }
  0x8f   :  { %3368 = vmatmul.mubr.msk.bf16.vlgmr.msra.gmra.mrb[24].mxu1 %vm412_vm2, %v3902_v30  ;;  %1897 = vmatpush1.bf16.msra.mxu0 %v3594_v43  ;;  %v3611_v30 = vld [vmem:[%s4957_s2 + $0xdc] ss:$52 sps:$4 sm:$0xff]   ;;  %v3677_v43 = vld [vmem:[%s4957_s2 + $0x164] ss:$52 sps:$4 sm:$0xff]  }
  0x90   :  { %1938 = vmatpush1.bf16.msra.mxu1 %v3597_v44  ;;  %1898 = vmatprep.subr.bf16.mxu0 %v3602_v45  ;;  %v3680_v44 = vld [vmem:[%s4957_s2 + $0x1c4] ss:$52 sps:$4 sm:$0x3f]   ;;  %v3683_v45 = vld [vmem:[%s4957_s2 + $0x1cc] ss:$52 sps:$4 sm:$0x3f]  }
  0x91   :  { %1939 = vmatprep.subr.bf16.mxu1 %v3605_v46  ;;  %1928 = vmatprep.mubr.bf16.mxu0 %v3785_v1  ;;  %v3672_v46 = vld [vmem:[%s4957_s2 + $0x158] ss:$52 sps:$4 sm:$0xff]  }
  0x92   :  { %1969 = vmatprep.mubr.bf16.mxu1 %v3785_v1 }
  0x93   :  { %1899 = vmatpush1.bf16.msra.mxu0 %v3600_v47  ;;  %v3675_v47 = vld [vmem:[%s4957_s2 + $0x160] ss:$52 sps:$4 sm:$0xff]  }
  0x94   :  { %1940 = vmatpush1.bf16.msra.mxu1 %v3603_v48  ;;  %1900 = vmatprep.subr.bf16.mxu0 %v3608_v49  ;;  %v3678_v48 = vld [vmem:[%s4957_s2 + $0x1c0] ss:$52 sps:$4 sm:$0x3f]   ;;  %v3681_v49 = vld [vmem:[%s4957_s2 + $0x1c8] ss:$52 sps:$4 sm:$0x3f]  }
  0x95   :  { %1941 = vmatprep.subr.bf16.mxu1 %v3611_v30  ;;  %v1885_v30 = vand.u32 %v3680_v44, %v3875_v19  ;;  %v3736_v44 = vld [vmem:[%s4958_s3 + $0x1c] ss:$52 sps:$4 sm:$0xff]  }
  0x97   :  { %1901 = vmatpush1.bf16.msra.mxu0 %v3606_v50  ;;  %v1891_v50 = vand.u32 %v3683_v45, %v3875_v19  ;;  %v3739_v45 = vld [vmem:[%s4958_s3 + $0x24] ss:$52 sps:$4 sm:$0xff]  }
  0x98   :  { %1942 = vmatpush1.bf16.msra.mxu1 %v3609_v51  ;;  %1902 = vmatprep.subr.bf16.mxu0 %v3614_v52  ;;  %v1882_v51 = vand.u32 %v3678_v48, %v3875_v19  ;;  %v1888_v52 = vand.u32 %v3681_v49, %v3875_v19  ;;  %v3742_v48 = vld [vmem:[%s4958_s3 + $0x84] ss:$52 sps:$4 sm:$0xff]   ;;  %v3745_v49 = vld [vmem:[%s4958_s3 + $0x8c] ss:$52 sps:$4 sm:$0xff]  }
  0x99   :  { %1943 = vmatprep.subr.bf16.mxu1 %v3617_v53  ;;  %v3686_v53 = vld [vmem:[%s4958_s3 + $0x4] ss:$52 sps:$4 sm:$0xff]  }
  0x9b   :  { %1903 = vmatpush1.bf16.msra.mxu0 %v3612_v56  ;;  %v3690_v56 = vld [vmem:[%s4958_s3 + $0x6c] ss:$52 sps:$4 sm:$0xff]  }
  0x9c   :  { %1944 = vmatpush1.bf16.msra.mxu1 %v3615_v58  ;;  %1904 = vmatprep.subr.bf16.mxu0 %v1861_v60  ;;  %v3691_v58 = vld [vmem:[%s4957_s2 + $0x98] ss:$52 sps:$4 sm:$0xff]   ;;  %v3692_v60 = vld [vmem:[%s4958_s3 + $0xd0] ss:$52 sps:$4 sm:$0xff]  }
  0x9d   :  { %1945 = vmatprep.subr.bf16.mxu1 %v1867_v61  ;;  %v3695_v61 = vld [vmem:[%s4957_s2 + $0x100] ss:$52 sps:$4 sm:$0xff]  }
  0x9f   :  { %1905 = vmatpush1.bf16.msra.mxu0 %v1858_v62  ;;  %v3698_v62 = vld [vmem:[%s4958_s3 + $0x13c] ss:$52 sps:$4 sm:$0xff]  }
  0xa0   :  { %1946 = vmatpush1.bf16.msra.mxu1 %v1864_v63  ;;  %1978 = vmatprep.subr.bf16.mxu0 %v3626_v0  ;;  %v3702_v63 = vld [vmem:[%s4958_s3 + $0x1a4] ss:$52 sps:$4 sm:$0x3f]  }
  0xa1   :  { %2019 = vmatprep.subr.bf16.mxu1 %v3629_v2  ;;  %v3696_v0 = vld [vmem:[%s4958_s3 + $0x138] ss:$52 sps:$4 sm:$0xff]   ;;  %v3699_v2 = vld [vmem:[%s4957_s2 + $0x168] ss:$52 sps:$4 sm:$0xff]  }
  0xa2   :  { %3226 = vmatmul.mubr.msk.bf16.vlgmr.msra.gmra.mrb[28].mxu0 %vm412_vm2, %v4389_v7 }
  0xa3   :  { %3227 = vmatmul.mubr.msk.bf16.vlgmr.msra.gmra.mrb[28].mxu1 %vm412_vm2, %v4389_v7  ;;  %1979 = vmatpush1.bf16.msra.mxu0 %v3624_v3  ;;  %v3700_v3 = vld [vmem:[%s4958_s3 + $0x1a0] ss:$52 sps:$4 sm:$0x3f]  }
  0xa4   :  { %2020 = vmatpush1.bf16.msra.mxu1 %v3627_v4  ;;  %1980 = vmatprep.subr.bf16.mxu0 %v3632_v5  ;;  %v3703_v4 = vld [vmem:[%s4957_s2 + $0x1d0] ss:$52 sps:$4 sm:$0x3f]   ;;  %v2573_v5 = vand.u32 %v3702_v63, %v3875_v19 }
  0xa5   :  { %2021 = vmatprep.subr.bf16.mxu1 %v3635_v6  ;;  %2010 = vmatprep.mubr.bf16.mxu0 %v3785_v1  ;;  %v1894_v6 = vand.u32 %v3703_v4, %v3875_v19 }
  0xa6   :  { %2051 = vmatprep.mubr.bf16.mxu1 %v3785_v1 }
  0xa7   :  { %1981 = vmatpush1.bf16.msra.mxu0 %v3630_v8  ;;  %v2570_v8 = vand.u32 %v3700_v3, %v3875_v19 }
  0xa8   :  { %2022 = vmatpush1.bf16.msra.mxu1 %v3633_v9  ;;  %1982 = vmatprep.subr.bf16.mxu0 %v3638_v10  ;;  %v3706_v9 = vld [vmem:[%s4958_s3 + $0xc] ss:$52 sps:$4 sm:$0xff]   ;;  %v3709_v10 = vld [vmem:[%s4958_s3 + $0x14] ss:$52 sps:$4 sm:$0xff]  }
  0xa9   :  { %2023 = vmatprep.subr.bf16.mxu1 %v3641_v11  ;;  %v3704_v11 = vld [vmem:[%s4958_s3 + $0x8] ss:$52 sps:$4 sm:$0xff]  }
  0xab   :  { %1983 = vmatpush1.bf16.msra.mxu0 %v3636_v12  ;;  %v3707_v12 = vld [vmem:[%s4958_s3 + $0x10] ss:$52 sps:$4 sm:$0xff]  }
  0xac   :  { %2024 = vmatpush1.bf16.msra.mxu1 %v3639_v13  ;;  %1984 = vmatprep.subr.bf16.mxu0 %v3644_v14  ;;  %v3712_v13 = vld [vmem:[%s4958_s3 + $0x74] ss:$52 sps:$4 sm:$0xff]   ;;  %v3715_v14 = vld [vmem:[%s4958_s3 + $0x7c] ss:$52 sps:$4 sm:$0xff]  }
  0xad   :  { %2025 = vmatprep.subr.bf16.mxu1 %v3647_v15  ;;  %v3710_v15 = vld [vmem:[%s4958_s3 + $0x70] ss:$52 sps:$4 sm:$0xff]  }
  0xaf   :  { %1985 = vmatpush1.bf16.msra.mxu0 %v3642_v20  ;;  %v3721_v20 = vld [vmem:[%s4958_s3 + $0xe4] ss:$52 sps:$4 sm:$0xff]  }
  0xb0   :  { %2026 = vmatpush1.bf16.msra.mxu1 %v3645_v21  ;;  %1986 = vmatprep.subr.bf16.mxu0 %v1873_v24  ;;  %v3716_v21 = vld [vmem:[%s4958_s3 + $0xd8] ss:$52 sps:$4 sm:$0xff]  }
  0xb1   :  { %2027 = vmatprep.subr.bf16.mxu1 %v1879_v25  ;;  %v3727_v24 = vld [vmem:[%s4958_s3 + $0x14c] ss:$52 sps:$4 sm:$0xff]  }
  0xb2   :  { %v3730_v25 = vld [vmem:[%s4958_s3 + $0x1ac] ss:$52 sps:$4 sm:$0x3f]  }
  0xb3   :  { %1987 = vmatpush1.bf16.msra.mxu0 %v1870_v26  ;;  %v3733_v26 = vld [vmem:[%s4958_s3 + $0x1b4] ss:$52 sps:$4 sm:$0x3f]  }
  0xb4   :  { %2028 = vmatpush1.bf16.msra.mxu1 %v1876_v27  ;;  %2060 = vmatprep.subr.bf16.mxu0 %v3656_v28  ;;  %v3722_v27 = vld [vmem:[%s4958_s3 + $0x140] ss:$52 sps:$4 sm:$0xff]   ;;  %v3725_v28 = vld [vmem:[%s4958_s3 + $0x148] ss:$52 sps:$4 sm:$0xff]  }
  0xb5   :  { %2101 = vmatprep.subr.bf16.mxu1 %v3659_v29  ;;  %v3728_v29 = vld [vmem:[%s4958_s3 + $0x1a8] ss:$52 sps:$4 sm:$0x3f]  }
  0xb6   :  { %3228 = vmatmul.mubr.msk.bf16.vlgmr.msra.gmra.mrb[32].mxu0 %vm412_vm2, %v4389_v7 }
  0xb7   :  { %3229 = vmatmul.mubr.msk.bf16.vlgmr.msra.gmra.mrb[32].mxu1 %vm412_vm2, %v4389_v7  ;;  %2061 = vmatpush1.bf16.msra.mxu0 %v3654_v31  ;;  %v3731_v31 = vld [vmem:[%s4958_s3 + $0x1b0] ss:$52 sps:$4 sm:$0x3f]  }
  0xb8   :  { %2102 = vmatpush1.bf16.msra.mxu1 %v3657_v32  ;;  %2062 = vmatprep.subr.bf16.mxu0 %v3662_v33  ;;  %v2579_v32 = vand.u32 %v3730_v25, %v3875_v19  ;;  %v2585_v33 = vand.u32 %v3733_v26, %v3875_v19  ;;  %v3776_v25 = vld [vmem:[%s4958_s3 + $0x160] ss:$52 sps:$4 sm:$0xff]   ;;  %v3779_v26 = vld [vmem:[%s4958_s3 + $0x168] ss:$52 sps:$4 sm:$0xff]  }
  0xb9   :  { %2103 = vmatprep.subr.bf16.mxu1 %v3665_v34  ;;  %2092 = vmatprep.mubr.bf16.mxu0 %v3785_v1 }
  0xba   :  { %2133 = vmatprep.mubr.bf16.mxu1 %v3785_v1 }
  0xbb   :  { %2063 = vmatpush1.bf16.msra.mxu0 %v3660_v35 }
  0xbc   :  { %2104 = vmatpush1.bf16.msra.mxu1 %v3663_v36  ;;  %2064 = vmatprep.subr.bf16.mxu0 %v3668_v37 }
  0xbd   :  { %2105 = vmatprep.subr.bf16.mxu1 %v3671_v38 }
  0xbf   :  { %2065 = vmatpush1.bf16.msra.mxu0 %v3666_v40  ;;  %v2576_v40 = vand.u32 %v3728_v29, %v3875_v19 }
  0xc0   :  { %2106 = vmatpush1.bf16.msra.mxu1 %v3669_v41  ;;  %2066 = vmatprep.subr.bf16.mxu0 %v3674_v42  ;;  %v2582_v41 = vand.u32 %v3731_v31, %v3875_v19 }
  0xc1   :  { %2107 = vmatprep.subr.bf16.mxu1 %v3677_v43 }
  0xc3   :  { %2067 = vmatpush1.bf16.msra.mxu0 %v3672_v46  ;;  %v3734_v46 = vld [vmem:[%s4958_s3 + $0x18] ss:$52 sps:$4 sm:$0xff]  }
  0xc4   :  { %2108 = vmatpush1.bf16.msra.mxu1 %v3675_v47  ;;  %2068 = vmatprep.subr.bf16.mxu0 %v1885_v30  ;;  %v3737_v47 = vld [vmem:[%s4958_s3 + $0x20] ss:$52 sps:$4 sm:$0xff]  }
  0xc5   :  { %2109 = vmatprep.subr.bf16.mxu1 %v1891_v50  ;;  %v3740_v30 = vld [vmem:[%s4958_s3 + $0x80] ss:$52 sps:$4 sm:$0xff]   ;;  %v3743_v50 = vld [vmem:[%s4958_s3 + $0x88] ss:$52 sps:$4 sm:$0xff]  }
  0xc7   :  { %2069 = vmatpush1.bf16.msra.mxu0 %v1882_v51  ;;  %v3748_v51 = vld [vmem:[%s4958_s3 + $0xec] ss:$52 sps:$4 sm:$0xff]  }
  0xc8   :  { %2110 = vmatpush1.bf16.msra.mxu1 %v1888_v52  ;;  %3371 = vmatprep.subr.bf16.mxu0 %v3787_v17  ;;  %v3751_v52 = vld [vmem:[%s4958_s3 + $0xf4] ss:$52 sps:$4 sm:$0xff]  }
  0xc9   :  { %2608 = vmatprep.subr.bf16.mxu1 %v3686_v53  ;;  %v3746_v53 = vld [vmem:[%s4958_s3 + $0xe8] ss:$52 sps:$4 sm:$0xff]  }
  0xca   :  { %3230 = vmatmul.mubr.msk.bf16.vlgmr.msra.gmra.mrb[36].mxu0 %vm412_vm2, %v4389_v7 }
  0xcb   :  { %3231 = vmatmul.mubr.msk.bf16.vlgmr.msra.gmra.mrb[36].mxu1 %vm412_vm2, %v4389_v7  ;;  %3372 = vmatpush3.bf16.msra.mxu0 %v3687_v55  ;;  %v3754_v55 = vld [vmem:[%s4958_s3 + $0x154] ss:$52 sps:$4 sm:$0xff]  }
  0xcc   :  { %2609 = vmatpush1.bf16.msra.mxu1 %v3684_v54  ;;  %3373 = vmatprep.subr.bf16.mxu0 %v3787_v17  ;;  %v3749_v54 = vld [vmem:[%s4958_s3 + $0xf0] ss:$52 sps:$4 sm:$0xff]  }
  0xcd   :  { %2610 = vmatprep.subr.bf16.mxu1 %v3690_v56  ;;  %3381 = vmatprep.mubr.msk.bf16.mxu0 %vm3788_vm3, %v3787_v17  ;;  %v3757_v56 = vld [vmem:[%s4958_s3 + $0x15c] ss:$52 sps:$4 sm:$0xff]  }
  0xce   :  { %2640 = vmatprep.mubr.bf16.mxu1 %v3785_v1 }
  0xcf   :  { %3374 = vmatpush3.bf16.msra.mxu0 %v3691_v58  ;;  %v3763_v58 = vld [vmem:[%s4958_s3 + $0x1c4] ss:$52 sps:$4 sm:$0x3f]  }
  0xd0   :  { %2611 = vmatpush1.bf16.msra.mxu1 %v3688_v57  ;;  %3375 = vmatprep.subr.bf16.mxu0 %v3787_v17  ;;  %v3760_v57 = vld [vmem:[%s4958_s3 + $0x1bc] ss:$52 sps:$4 sm:$0x3f]  }
  0xd1   :  { %2612 = vmatprep.subr.bf16.mxu1 %v3694_v59  ;;  %v3752_v59 = vld [vmem:[%s4958_s3 + $0x150] ss:$52 sps:$4 sm:$0xff]   ;;  %v2591_v63 = vand.u32 %v3760_v57, %v3875_v19 }
  0xd3   :  { %3376 = vmatpush3.bf16.msra.mxu0 %v3695_v61  ;;  %v3758_v61 = vld [vmem:[%s4958_s3 + $0x1b8] ss:$52 sps:$4 sm:$0x3f]  }
  0xd4   :  { %2613 = vmatpush1.bf16.msra.mxu1 %v3692_v60  ;;  %3377 = vmatprep.subr.bf16.mxu0 %v3787_v17  ;;  %v3755_v60 = vld [vmem:[%s4958_s3 + $0x158] ss:$52 sps:$4 sm:$0xff]  }
  0xd5   :  { %2614 = vmatprep.subr.bf16.mxu1 %v3698_v62  ;;  %v3761_v62 = vld [vmem:[%s4958_s3 + $0x1c0] ss:$52 sps:$4 sm:$0x3f]  }
  0xd7   :  { %3378 = vmatpush3.bf16.msra.mxu0 %v3699_v2 }
  0xd8   :  { %2615 = vmatpush1.bf16.msra.mxu1 %v3696_v0  ;;  %3379 = vmatprep.subr.bf16.mxu0 %v3787_v17  ;;  %v2597_v0 = vand.u32 %v3763_v58, %v3875_v19 }
  0xd9   :  { %2616 = vmatprep.subr.bf16.mxu1 %v2573_v5 }
  0xdb   :  { %3380 = vmatpush3.bf16.msra.mxu0 %v1894_v6 }
  0xdc   :  { %2617 = vmatpush1.bf16.msra.mxu1 %v2570_v8  ;;  %2649 = vmatprep.subr.bf16.mxu0 %v3706_v9  ;;  %v2588_v9 = vand.u32 %v3758_v61, %v3875_v19 }
  0xdd   :  { %2690 = vmatprep.subr.bf16.mxu1 %v3709_v10  ;;  %v2594_v10 = vand.u32 %v3761_v62, %v3875_v19 }
  0xde   :  { %3382 = vmatmul.mubr.msk.bf16.vlgmr.msra.gmra.mrb[40].mxu0 %vm412_vm2, %v4389_v7 }
  0xdf   :  { %3298 = vmatmul.mubr.msk.bf16.vlgmr.msra.gmra.mrb[40].mxu1 %vm412_vm2, %v4389_v7  ;;  %2650 = vmatpush1.bf16.msra.mxu0 %v3704_v11 }
  0xe0   :  { %2691 = vmatpush1.bf16.msra.mxu1 %v3707_v12  ;;  %2651 = vmatprep.subr.bf16.mxu0 %v3712_v13  ;;  %v3766_v13 = vld [vmem:[%s4958_s3 + $0x2c] ss:$52 sps:$4 sm:$0xff]  }
  0xe1   :  { %2692 = vmatprep.subr.bf16.mxu1 %v3715_v14  ;;  %2681 = vmatprep.mubr.bf16.mxu0 %v3785_v1  ;;  %v3764_v14 = vld [vmem:[%s4958_s3 + $0x28] ss:$52 sps:$4 sm:$0xff]  }
  0xe2   :  { %2722 = vmatprep.mubr.bf16.mxu1 %v3785_v1 }
  0xe3   :  { %2652 = vmatpush1.bf16.msra.mxu0 %v3710_v15  ;;  %v3767_v15 = vld [vmem:[%s4958_s3 + $0x30] ss:$52 sps:$4 sm:$0xff]  }
  0xe4   :  { %2693 = vmatpush1.bf16.msra.mxu1 %v3713_v16  ;;  %2653 = vmatprep.subr.bf16.mxu0 %v3718_v18  ;;  %v3770_v16 = vld [vmem:[%s4958_s3 + $0x94] ss:$52 sps:$4 sm:$0xff]   ;;  %v3768_v18 = vld [vmem:[%s4958_s3 + $0x90] ss:$52 sps:$4 sm:$0xff]  }
  0xe5   :  { %2694 = vmatprep.subr.bf16.mxu1 %v3721_v20  ;;  %v3771_v20 = vld [vmem:[%s4958_s3 + $0x98] ss:$52 sps:$4 sm:$0xff]  }
  0xe7   :  { %2654 = vmatpush1.bf16.msra.mxu0 %v3716_v21  ;;  %v3774_v21 = vld [vmem:[%s4958_s3 + $0xfc] ss:$52 sps:$4 sm:$0xff]  }
  0xe8   :  { %2695 = vmatpush1.bf16.msra.mxu1 %v3719_v22  ;;  %2655 = vmatprep.subr.bf16.mxu0 %v3724_v23  ;;  %v3772_v22 = vld [vmem:[%s4958_s3 + $0xf8] ss:$52 sps:$4 sm:$0xff]   ;;  %v3775_v23 = vld [vmem:[%s4958_s3 + $0x100] ss:$52 sps:$4 sm:$0xff]  }
  0xe9   :  { %2696 = vmatprep.subr.bf16.mxu1 %v3727_v24  ;;  %v4644_v34 = vpop.f32.mrb[0].mxu0  ;;  %v3782_v24 = vld [vmem:[%s4958_s3 + $0x1cc] ss:$52 sps:$4 sm:$0x3f]  }
  0xea   :  { %v4646_v35 = vpop.f32.mrb[0].mxu1  ;;  %v4648_v36 = vpop.f32.mrb[1].mxu0  ;;  %v2603_v29 = vand.u32 %v3782_v24, %v3875_v19 }
  0xeb   :  { %v4650_v37 = vpop.f32.mrb[1].mxu1  ;;  %v497_v38 = vpop.f32.mrb[2].mxu0  ;;  %2656 = vmatpush1.bf16.msra.mxu0 %v3722_v27  ;;  %v3780_v27 = vld [vmem:[%s4958_s3 + $0x1c8] ss:$52 sps:$4 sm:$0x3f]  }
  0xec   :  { %v538_v39 = vpop.f32.mrb[2].mxu1  ;;  %2697 = vmatpush1.bf16.msra.mxu1 %v3725_v28  ;;  %v498_v42 = vpop.f32.mrb[3].mxu0  ;;  %2657 = vmatprep.subr.bf16.mxu0 %v2579_v32  ;;  %v3783_v28 = vld [vmem:[%s4958_s3 + $0x1d0] ss:$52 sps:$4 sm:$0x3f]  }
  0xed   :  { %v539_v43 = vpop.f32.mrb[3].mxu1  ;;  %2698 = vmatprep.subr.bf16.mxu1 %v2585_v33  ;;  %v2606_v42 = vand.u32 %v3783_v28, %v3875_v19 }
  0xef   :  { %2658 = vmatpush1.bf16.msra.mxu0 %v2576_v40 }
  0xf0   :  { %2699 = vmatpush1.bf16.msra.mxu1 %v2582_v41  ;;  %2731 = vmatprep.subr.bf16.mxu0 %v3736_v44  ;;  %v2600_v41 = vand.u32 %v3780_v27, %v3875_v19 }
  0xf1   :  { %2772 = vmatprep.subr.bf16.mxu1 %v3739_v45 }
  0xf2   :  { %3299 = vmatmul.mubr.msk.bf16.vlgmr.msra.gmra.mrb[44].mxu0 %vm412_vm2, %v4389_v7 }
  0xf3   :  { %3300 = vmatmul.mubr.msk.bf16.vlgmr.msra.gmra.mrb[44].mxu1 %vm412_vm2, %v4389_v7  ;;  %2732 = vmatpush1.bf16.msra.mxu0 %v3734_v46 }
  0xf4   :  { %2773 = vmatpush1.bf16.msra.mxu1 %v3737_v47  ;;  %2733 = vmatprep.subr.bf16.mxu0 %v3742_v48 }
  0xf5   :  { %2774 = vmatprep.subr.bf16.mxu1 %v3745_v49  ;;  %2763 = vmatprep.mubr.bf16.mxu0 %v3785_v1 }
  0xf6   :  { %2804 = vmatprep.mubr.bf16.mxu1 %v3785_v1 }
  0xf7   :  { %2734 = vmatpush1.bf16.msra.mxu0 %v3740_v30 }
  0xf8   :  { %2775 = vmatpush1.bf16.msra.mxu1 %v3743_v50  ;;  %2735 = vmatprep.subr.bf16.mxu0 %v3748_v51 }
  0xf9   :  { %2776 = vmatprep.subr.bf16.mxu1 %v3751_v52 }
  0xfb   :  { %2736 = vmatpush1.bf16.msra.mxu0 %v3746_v53 }
  0xfc   :  { %2777 = vmatpush1.bf16.msra.mxu1 %v3749_v54  ;;  %2737 = vmatprep.subr.bf16.mxu0 %v3754_v55 }
  0xfd   :  { %2778 = vmatprep.subr.bf16.mxu1 %v3757_v56  ;;  %v4722_v2 = vpop.f32.mrb[4].mxu0 }
  0xfe   :  { %v4724_v3 = vpop.f32.mrb[4].mxu1  ;;  %v4726_v4 = vpop.f32.mrb[5].mxu0 }
  0xff   :  { %v4728_v5 = vpop.f32.mrb[5].mxu1  ;;  %v579_v6 = vpop.f32.mrb[6].mxu0  ;;  %2738 = vmatpush1.bf16.msra.mxu0 %v3752_v59 }
 0x100   :  { %v620_v8 = vpop.f32.mrb[6].mxu1  ;;  %2779 = vmatpush1.bf16.msra.mxu1 %v3755_v60  ;;  %v580_v11 = vpop.f32.mrb[7].mxu0  ;;  %2739 = vmatprep.subr.bf16.mxu0 %v2591_v63 }
 0x101   :  { %v621_v12 = vpop.f32.mrb[7].mxu1  ;;  %2780 = vmatprep.subr.bf16.mxu1 %v2597_v0 }
 0x103   :  { %2740 = vmatpush1.bf16.msra.mxu0 %v2588_v9 }
 0x104   :  { %2781 = vmatpush1.bf16.msra.mxu1 %v2594_v10  ;;  %2813 = vmatprep.subr.bf16.mxu0 %v3766_v13 }
 0x105   :  { %3385 = vmatprep.subr.bf16.mxu1 %v3787_v17 }
 0x106   :  { %3301 = vmatmul.mubr.msk.bf16.vlgmr.msra.gmra.mrb[48].mxu0 %vm412_vm2, %v4389_v7 }
 0x107   :  { %3302 = vmatmul.mubr.msk.bf16.vlgmr.msra.gmra.mrb[48].mxu1 %vm412_vm2, %v4389_v7  ;;  %2814 = vmatpush1.bf16.msra.mxu0 %v3764_v14 }
 0x108   :  { %3386 = vmatpush3.bf16.msra.mxu1 %v3767_v15  ;;  %2815 = vmatprep.subr.bf16.mxu0 %v3770_v16 }
 0x109   :  { %3387 = vmatprep.subr.bf16.mxu1 %v3787_v17  ;;  %2845 = vmatprep.mubr.bf16.mxu0 %v3785_v1  ;;  %v3778_v1 = vld [vmem:[%s4958_s3 + $0x164] ss:$52 sps:$4 sm:$0xff]  }
 0x10a   :  { %3395 = vmatprep.mubr.msk.bf16.mxu1 %vm3788_vm3, %v3787_v17 }
 0x10b   :  { %2816 = vmatpush1.bf16.msra.mxu0 %v3768_v18 }
 0x10c   :  { %3388 = vmatpush3.bf16.msra.mxu1 %v3771_v20  ;;  %2817 = vmatprep.subr.bf16.mxu0 %v3774_v21 }
 0x10d   :  { %3389 = vmatprep.subr.bf16.mxu1 %v3787_v17 }
 0x10f   :  { %2818 = vmatpush1.bf16.msra.mxu0 %v3772_v22 }
 0x110   :  { %3390 = vmatpush3.bf16.msra.mxu1 %v3775_v23  ;;  %2819 = vmatprep.subr.bf16.mxu0 %v3778_v1 }
 0x111   :  { %3391 = vmatprep.subr.bf16.mxu1 %v3787_v17  ;;  %v4789_v31 = vpop.f32.mrb[8].mxu0 }
 0x112   :  { %v4791_v32 = vpop.f32.mrb[8].mxu1  ;;  %v4793_v33 = vpop.f32.mrb[9].mxu0 }
 0x113   :  { %v4795_v38 = vpop.f32.mrb[9].mxu1  ;;  %v661_v39 = vpop.f32.mrb[10].mxu0  ;;  %2820 = vmatpush1.bf16.msra.mxu0 %v3776_v25 }
 0x114   :  { %v702_v40 = vpop.f32.mrb[10].mxu1  ;;  %3392 = vmatpush3.bf16.msra.mxu1 %v3779_v26  ;;  %v662_v43 = vpop.f32.mrb[11].mxu0  ;;  %2821 = vmatprep.subr.bf16.mxu0 %v2603_v29 }
 0x115   :  { %v703_v44 = vpop.f32.mrb[11].mxu1  ;;  %3393 = vmatprep.subr.bf16.mxu1 %v3787_v17 }
 0x117   :  { %2822 = vmatpush1.bf16.msra.mxu0 %v2600_v41 }
 0x118   :  { %3394 = vmatpush3.bf16.msra.mxu1 %v2606_v42 }
 0x11a   :  { %3303 = vmatmul.mubr.msk.bf16.vlgmr.msra.gmra.mrb[52].mxu0 %vm412_vm2, %v4389_v7 }
 0x11b   :  { %3396 = vmatmul.mubr.msk.bf16.vlgmr.msra.gmra.mrb[52].mxu1 %vm412_vm2, %v4389_v7 }
 0x125   :  { %v4804_v45 = vpop.f32.mrb[12].mxu0 }
 0x126   :  { %v4806_v46 = vpop.f32.mrb[12].mxu1  ;;  %v3355_v47 = vpop.f32.mrb[13].mxu0 }
 0x127   :  { %v1457_v19 = vmax.f32 %v4644_v34, %v4806_v46  ;;  %v4810_v48 = vpop.f32.mrb[13].mxu1  ;;  %v742_v49 = vpop.f32.mrb[14].mxu0 }
 0x128   :  { %v1458_v17 = vmax.f32 %v4648_v36, %v4810_v48  ;;  %v1209_v30 = vpop.f32.mrb[14].mxu1  ;;  %v3356_v50 = vpop.f32.mrb[15].mxu0 }
 0x129   :  { %v1210_v51 = vpop.f32.mrb[15].mxu1 }
 0x139   :  { %v4814_v52 = vpop.f32.mrb[16].mxu0 }
 0x13a   :  { %v4816_v7 = vpop.f32.mrb[16].mxu1  ;;  %v1459_v53 = vmax.f32 %v4646_v35, %v4814_v52  ;;  %v4822_v55 = vpop.f32.mrb[17].mxu0 }
 0x13b   :  { %v1461_v54 = vmax.f32 %v4722_v2, %v4816_v7  ;;  %v4824_v56 = vpop.f32.mrb[17].mxu1  ;;  %v1460_v57 = vmax.f32 %v4650_v37, %v4822_v55  ;;  %v1250_v59 = vpop.f32.mrb[18].mxu0 }
 0x13c   :  { %v1462_v58 = vmax.f32 %v4726_v4, %v4824_v56  ;;  %v1291_v60 = vpop.f32.mrb[18].mxu1  ;;  %v1251_v61 = vpop.f32.mrb[19].mxu0 }
 0x13d   :  { %v1292_v62 = vpop.f32.mrb[19].mxu1 }
 0x14d   :  { %v4830_v63 = vpop.f32.mrb[20].mxu0 }
 0x14e   :  { %v4832_v0 = vpop.f32.mrb[20].mxu1  ;;  %v1463_v6 = vmax.f32 %v4724_v3, %v4830_v63  ;;  %v4838_v9 = vpop.f32.mrb[21].mxu0 }
 0x14f   :  { %v1465_v8 = vmax.f32 %v4789_v31, %v4832_v0  ;;  %v4840_v10 = vpop.f32.mrb[21].mxu1  ;;  %v1464_v11 = vmax.f32 %v4728_v5, %v4838_v9  ;;  %v1332_v13 = vpop.f32.mrb[22].mxu0 }
 0x150   :  { %v1466_v12 = vmax.f32 %v4793_v33, %v4840_v10  ;;  %v1373_v14 = vpop.f32.mrb[22].mxu1  ;;  %v1333_v15 = vpop.f32.mrb[23].mxu0 }
 0x151   :  { %v1374_v16 = vpop.f32.mrb[23].mxu1 }
 0x161   :  { %v4846_v18 = vpop.f32.mrb[24].mxu0 }
 0x162   :  { %v4848_v20 = vpop.f32.mrb[24].mxu1  ;;  %v1467_v21 = vmax.f32 %v4791_v32, %v4846_v18  ;;  %v4854_v23 = vpop.f32.mrb[25].mxu0 }
 0x163   :  { %v3369_v1 = vpop.f32.mrb[25].mxu1  ;;  %v1414_v25 = vpop.f32.mrb[26].mxu0 }
 0x164   :  { %v1454_v26 = vpop.f32.mrb[26].mxu1  ;;  %v1415_v27 = vpop.f32.mrb[27].mxu0 }
 0x165   :  { %v3370_v28 = vpop.f32.mrb[27].mxu1 }
 0x166   :  { %v4870_v28 = vpop.permute.xlu0 %2923 }
 0x175   :  { %v1930_v29 = vpop.f32.mrb[28].mxu0 }
 0x176   :  { %v1971_v39 = vpop.f32.mrb[28].mxu1  ;;  %v1932_v40 = vpop.f32.mrb[29].mxu0 }
 0x177   :  { %v1973_v41 = vpop.f32.mrb[29].mxu1  ;;  %v1934_v42 = vpop.f32.mrb[30].mxu0 }
 0x178   :  { %v1975_v43 = vpop.f32.mrb[30].mxu1  ;;  %v1935_v44 = vpop.f32.mrb[31].mxu0 }
 0x179   :  { %v1976_v47 = vpop.f32.mrb[31].mxu1 }
 0x189   :  { %v2012_v49 = vpop.f32.mrb[32].mxu0 }
 0x18a   :  { %v4858_v30 = vpop.f32.mrb[32].mxu1  ;;  %v2014_v50 = vpop.f32.mrb[33].mxu0 }
 0x18b   :  { %v4860_v51 = vpop.f32.mrb[33].mxu1  ;;  %v2016_v59 = vpop.f32.mrb[34].mxu0 }
 0x18c   :  { %v2057_v60 = vpop.f32.mrb[34].mxu1  ;;  %v2017_v61 = vpop.f32.mrb[35].mxu0 }
 0x18d   :  { %v2058_v62 = vpop.f32.mrb[35].mxu1 }
 0x19d   :  { %v4862_v13 = vpop.f32.mrb[36].mxu0 }
 0x19e   :  { %v4864_v14 = vpop.f32.mrb[36].mxu1  ;;  %v4866_v15 = vpop.f32.mrb[37].mxu0 }
 0x19f   :  { %v4868_v16 = vpop.f32.mrb[37].mxu1  ;;  %v2098_v1 = vpop.f32.mrb[38].mxu0 }
 0x1a0   :  { %v2139_v25 = vpop.f32.mrb[38].mxu1  ;;  %v2099_v26 = vpop.f32.mrb[39].mxu0 }
 0x1a1   :  { %v2140_v27 = vpop.f32.mrb[39].mxu1 }
 0x1b1   :  { %v4872_v42 = vpop.f32.mrb[40].mxu0 }
 0x1b2   :  { %v2642_v43 = vpop.f32.mrb[40].mxu1  ;;  %v3383_v47 = vpop.f32.mrb[41].mxu0 }
 0x1b3   :  { %v2894_v44 = vmax.f32 %v1930_v29, %v2642_v43  ;;  %v2644_v59 = vpop.f32.mrb[41].mxu1  ;;  %v2179_v61 = vpop.f32.mrb[42].mxu0 }
 0x1b4   :  { %v2895_v60 = vmax.f32 %v1932_v40, %v2644_v59  ;;  %v2646_v62 = vpop.f32.mrb[42].mxu1  ;;  %v3384_v22 = vpop.f32.mrb[43].mxu0 }
 0x1b5   :  { %v2907_v24 = vmax.f32 %v1457_v19, %v2894_v44  ;;  %v2647_v1 = vpop.f32.mrb[43].mxu1 }
 0x1b6   :  { %v2908_v25 = vmax.f32 %v1458_v17, %v2895_v60 }
 0x1b7   :  { %v2926_v26 = vadd.f32 %v4870_v28, %v2907_v24 }
 0x1b8   :  { %v2927_v27 = vadd.f32 %v4870_v28, %v2908_v25 }
 0x1b9   :  { %v2939_v29 = vmax.f32 %v2926_v26, 0.0 }
 0x1ba   :  { %v2940_v43 = vmax.f32 %v2927_v27, 0.0 }
 0x1bc   :  { %v3312_v47 = vpack.c.bf16 %v2940_v43, %v2939_v29 }
 0x1be   :  { %3005 = vst [vmem:[%s4960_s6] sm:$0x77] %v3312_v47 }
 0x1c5   :  { %v2683_v40 = vpop.f32.mrb[44].mxu0 }
 0x1c6   :  { %v2724_v34 = vpop.f32.mrb[44].mxu1  ;;  %v2896_v46 = vmax.f32 %v1971_v39, %v2683_v40  ;;  %v2685_v22 = vpop.f32.mrb[45].mxu0 }
 0x1c7   :  { %v2898_v19 = vmax.f32 %v2012_v49, %v2724_v34  ;;  %v2726_v44 = vpop.f32.mrb[45].mxu1  ;;  %v2897_v59 = vmax.f32 %v1973_v41, %v2685_v22  ;;  %v2687_v48 = vpop.f32.mrb[46].mxu0 }
 0x1c8   :  { %v2899_v36 = vmax.f32 %v2014_v50, %v2726_v44  ;;  %v2728_v17 = vpop.f32.mrb[46].mxu1  ;;  %v2909_v24 = vmax.f32 %v1459_v53, %v2896_v46  ;;  %v2688_v61 = vpop.f32.mrb[47].mxu0 }
 0x1c9   :  { %v2911_v60 = vmax.f32 %v1461_v54, %v2898_v19  ;;  %v2729_v62 = vpop.f32.mrb[47].mxu1  ;;  %v2910_v39 = vmax.f32 %v1460_v57, %v2897_v59  ;;  %v4961_v17 = vmax.f32 %v4804_v45, %v4848_v20 }
 0x1ca   :  { %v2912_v41 = vmax.f32 %v1462_v58, %v2899_v36  ;;  %v2928_v49 = vadd.f32 %v4870_v28, %v2909_v24 }
 0x1cb   :  { %v2930_v50 = vadd.f32 %v4870_v28, %v2911_v60  ;;  %v2929_v35 = vadd.f32 %v4870_v28, %v2910_v39 }
 0x1cc   :  { %v2931_v52 = vadd.f32 %v4870_v28, %v2912_v41  ;;  %v2941_v2 = vmax.f32 %v2928_v49, 0.0 }
 0x1cd   :  { %v2943_v7 = vmax.f32 %v2930_v50, 0.0  ;;  %v2942_v53 = vmax.f32 %v2929_v35, 0.0 }
 0x1ce   :  { %v2944_v54 = vmax.f32 %v2931_v52, 0.0 }
 0x1cf   :  { %v3313_v1 = vpack.c.bf16 %v2942_v53, %v2941_v2 }
 0x1d0   :  { %v3314_v25 = vpack.c.bf16 %v2944_v54, %v2943_v7 }
 0x1d1   :  { %3006 = vst [vmem:[%s4960_s6 + $0x8] sm:$0x77] %v3313_v1 }
 0x1d2   :  { %3007 = vst [vmem:[%s4960_s6 + $0x10] sm:$0x77] %v3314_v25 }
 0x1d9   :  { %v2765_v37 = vpop.f32.mrb[48].mxu0 }
 0x1da   :  { %v2806_v4 = vpop.f32.mrb[48].mxu1  ;;  %v2900_v55 = vmax.f32 %v4858_v30, %v2765_v37  ;;  %v2767_v57 = vpop.f32.mrb[49].mxu0 }
 0x1db   :  { %v2902_v56 = vmax.f32 %v4862_v13, %v2806_v4  ;;  %v2808_v58 = vpop.f32.mrb[49].mxu1  ;;  %v2901_v26 = vmax.f32 %v4860_v51, %v2767_v57  ;;  %v2769_v29 = vpop.f32.mrb[50].mxu0 }
 0x1dc   :  { %v2903_v27 = vmax.f32 %v4866_v15, %v2808_v58  ;;  %v2810_v43 = vpop.f32.mrb[50].mxu1  ;;  %v2913_v47 = vmax.f32 %v1463_v6, %v2900_v55  ;;  %v2770_v34 = vpop.f32.mrb[51].mxu0 }
 0x1dd   :  { %v2915_v40 = vmax.f32 %v1465_v8, %v2902_v56  ;;  %v2811_v30 = vpop.f32.mrb[51].mxu1  ;;  %v2914_v13 = vmax.f32 %v1464_v11, %v2901_v26 }
 0x1de   :  { %v2916_v51 = vmax.f32 %v1466_v12, %v2903_v27  ;;  %v2932_v15 = vadd.f32 %v4870_v28, %v2913_v47 }
 0x1df   :  { %v2934_v46 = vadd.f32 %v4870_v28, %v2915_v40  ;;  %v2933_v3 = vadd.f32 %v4870_v28, %v2914_v13 }
 0x1e0   :  { %v2935_v63 = vadd.f32 %v4870_v28, %v2916_v51  ;;  %v2945_v31 = vmax.f32 %v2932_v15, 0.0 }
 0x1e1   :  { %v2947_v0 = vmax.f32 %v2934_v46, 0.0  ;;  %v2946_v6 = vmax.f32 %v2933_v3, 0.0 }
 0x1e2   :  { %v2948_v8 = vmax.f32 %v2935_v63, 0.0 }
 0x1e3   :  { %v3315_v19 = vpack.c.bf16 %v2946_v6, %v2945_v31 }
 0x1e4   :  { %v3316_v22 = vpack.c.bf16 %v2948_v8, %v2947_v0 }
 0x1e5   :  { %3008 = vst [vmem:[%s4960_s6 + $0x18] sm:$0x77] %v3315_v19 }
 0x1e6   :  { %3009 = vst [vmem:[%s4960_s6 + $0x20] sm:$0x77] %v3316_v22 }
 0x1ed   :  { %v2847_v5 = vpop.f32.mrb[52].mxu0 }
 0x1ee   :  { %v2888_v33 = vpop.f32.mrb[52].mxu1  ;;  %v2904_v9 = vmax.f32 %v4864_v14, %v2847_v5  ;;  %v2849_v11 = vpop.f32.mrb[53].mxu0  ;;  %v4962_v14 = vmax.f32 %v4795_v38, %v4854_v23 }
 0x1ef   :  { %v2906_v10 = vmax.f32 %v4872_v42, %v2888_v33  ;;  %v3397_v12 = vpop.f32.mrb[53].mxu1  ;;  %v2905_v44 = vmax.f32 %v4868_v16, %v2849_v11  ;;  %v2851_v59 = vpop.f32.mrb[54].mxu0 }
 0x1f0   :  { %v2891_v36 = vpop.f32.mrb[54].mxu1  ;;  %v2917_v48 = vmax.f32 %v1467_v21, %v2904_v9  ;;  %v2852_v60 = vpop.f32.mrb[55].mxu0 }
 0x1f1   :  { %v2919_v24 = vmax.f32 %v4961_v17, %v2906_v10  ;;  %v3398_v61 = vpop.f32.mrb[55].mxu1  ;;  %v2918_v42 = vmax.f32 %v4962_v14, %v2905_v44 }
 0x1f2   :  { %v2936_v62 = vadd.f32 %v4870_v28, %v2917_v48 }
 0x1f3   :  { %v2938_v16 = vadd.f32 %v4870_v28, %v2919_v24  ;;  %v2937_v39 = vadd.f32 %v4870_v28, %v2918_v42 }
 0x1f4   :  { %v2949_v41 = vmax.f32 %v2936_v62, 0.0 }
 0x1f5   :  { %v2951_v49 = vmax.f32 %v2938_v16, 0.0  ;;  %v2950_v32 = vmax.f32 %v2937_v39, 0.0 }
 0x1f7   :  { %v3318_v18 = vpack.c.bf16 %v2951_v49, %v2951_v49  ;;  %v3317_v21 = vpack.c.bf16 %v2950_v32, %v2949_v41 }
 0x1f9   :  { %3012 = vst.msk [vmem:[%s4960_s6 + $0x30] sm:$0x7] %vm3011_vm4, %v3318_v18  ;;  %3010 = vst [vmem:[%s4960_s6 + $0x28] sm:$0x77] %v3317_v21 }

// kernel: net_forward.4
= control target key start
LH: loop header
LB: loop body
LE: loop exit
PB: predicated region body
PF: predicated region fallthrough
CT: control target
= control target key end

     0   :  { %v960_v1 = vmov 0   ;;  %vm149_vm0 = vcmask 179200   ;;  %vm153_vm1 = vcmask 1042432   ;;  %vm736_vm2 = vcmask 1043456   ;;  %s1260_s0 = inlined_call_operand.vmem [shape: bf16[1,150,200], index: 0, kind: input, shape index: {}]   ;;  %s1261_s1 = inlined_call_operand.vmem [shape: bf16[1,150,200], index: 1, kind: input, shape index: {}]   ;;  %s1262_s4 = inlined_call_operand.vmem [shape: bf16[16,150], index: 4, kind: input, shape index: {}]   ;;  %s1263_s2 = inlined_call_operand.vmem [shape: bf16[1,150,200], index: 2, kind: input, shape index: {}]   ;;  %s1264_s3 = inlined_call_operand.vmem [shape: bf16[1,150,200], index: 3, kind: input, shape index: {}]   ;;  %s1265_s5 = inlined_call_operand.vmem [shape: f32[16,1], index: 5, kind: input, shape index: {}]   ;;  %s1266_s6 = inlined_call_operand.vmem [shape: bf16[1,16,200], index: 6, kind: output, shape index: {}]  }
   0x1   :  { %v841_v0 = vld [vmem:[%s1260_s0 + $0x4] ss:$8 sps:$4 sm:$0xff]   ;;  %840 = vset.pattern.permute.xlu0 %v960_v1  ;;  %v845_v3 = vld [vmem:[%s1260_s0] ss:$8 sps:$4 sm:$0xff]   ;;  %v847_v5 = vld [vmem:[%s1260_s0 + $0x14] ss:$8 sps:$4 sm:$0xff]  }
   0x2   :  { %v843_v2 = vld [vmem:[%s1261_s1 + $0x4] ss:$8 sps:$4 sm:$0xff]   ;;  %160 = vmatprep.subr.bf16.mxu0 %v841_v0  ;;  %v846_v4 = vld [vmem:[%s1261_s1] ss:$8 sps:$4 sm:$0xff]   ;;  %v849_v6 = vld [vmem:[%s1261_s1 + $0x14] ss:$8 sps:$4 sm:$0xff]  }
   0x3   :  { %323 = vmatprep.subr.bf16.mxu1 %v843_v2  ;;  %161 = vmatpush1.bf16.msra.mxu0 %v845_v3  ;;  %v851_v7 = vld [vmem:[%s1260_s0 + $0x10] ss:$8 sps:$4 sm:$0xff]   ;;  %v853_v9 = vld [vmem:[%s1260_s0 + $0x24] ss:$8 sps:$4 sm:$0xff]   ;;  %v857_v11 = vld [vmem:[%s1260_s0 + $0x20] ss:$8 sps:$4 sm:$0xff]  }
   0x4   :  { %324 = vmatpush1.bf16.msra.mxu1 %v846_v4  ;;  %162 = vmatprep.subr.bf16.mxu0 %v847_v5  ;;  %v852_v8 = vld [vmem:[%s1261_s1 + $0x10] ss:$8 sps:$4 sm:$0xff]   ;;  %v855_v10 = vld [vmem:[%s1261_s1 + $0x24] ss:$8 sps:$4 sm:$0xff]   ;;  %v858_v12 = vld [vmem:[%s1261_s1 + $0x20] ss:$8 sps:$4 sm:$0xff]  }
   0x5   :  { %325 = vmatprep.subr.bf16.mxu1 %v849_v6  ;;  %v859_v13 = vld [vmem:[%s1260_s0 + $0x34] ss:$8 sps:$4 sm:$0xff]   ;;  %v863_v15 = vld [vmem:[%s1260_s0 + $0x30] ss:$8 sps:$4 sm:$0xff]   ;;  %v865_v17 = vld [vmem:[%s1260_s0 + $0x44] ss:$8 sps:$4 sm:$0xff]  }
   0x6   :  { %v861_v14 = vld [vmem:[%s1261_s1 + $0x34] ss:$8 sps:$4 sm:$0xff]   ;;  %v864_v16 = vld [vmem:[%s1261_s1 + $0x30] ss:$8 sps:$4 sm:$0xff]   ;;  %v867_v18 = vld [vmem:[%s1261_s1 + $0x44] ss:$8 sps:$4 sm:$0xff]  }
   0x7   :  { %163 = vmatpush1.bf16.msra.mxu0 %v851_v7  ;;  %v869_v19 = vld [vmem:[%s1260_s0 + $0x40] ss:$8 sps:$4 sm:$0xff]   ;;  %v871_v21 = vld [vmem:[%s1260_s0 + $0x54] ss:$8 sps:$4 sm:$0xff]   ;;  %v875_v23 = vld [vmem:[%s1260_s0 + $0x50] ss:$8 sps:$4 sm:$0xff]  }
   0x8   :  { %326 = vmatpush1.bf16.msra.mxu1 %v852_v8  ;;  %164 = vmatprep.subr.bf16.mxu0 %v853_v9  ;;  %v870_v20 = vld [vmem:[%s1261_s1 + $0x40] ss:$8 sps:$4 sm:$0xff]   ;;  %v873_v22 = vld [vmem:[%s1261_s1 + $0x54] ss:$8 sps:$4 sm:$0xff]   ;;  %v876_v24 = vld [vmem:[%s1261_s1 + $0x50] ss:$8 sps:$4 sm:$0xff]  }
   0x9   :  { %327 = vmatprep.subr.bf16.mxu1 %v855_v10  ;;  %v877_v25 = vld [vmem:[%s1260_s0 + $0x64] ss:$8 sps:$4 sm:$0xff]   ;;  %v881_v27 = vld [vmem:[%s1260_s0 + $0x60] ss:$8 sps:$4 sm:$0xff]   ;;  %v883_v29 = vld [vmem:[%s1260_s0 + $0x74] ss:$8 sps:$4 sm:$0xff]  }
   0xa   :  { %v879_v26 = vld [vmem:[%s1261_s1 + $0x64] ss:$8 sps:$4 sm:$0xff]   ;;  %v882_v28 = vld [vmem:[%s1261_s1 + $0x60] ss:$8 sps:$4 sm:$0xff]   ;;  %v885_v30 = vld [vmem:[%s1261_s1 + $0x74] ss:$8 sps:$4 sm:$0xff]  }
   0xb   :  { %165 = vmatpush1.bf16.msra.mxu0 %v857_v11  ;;  %v899_v31 = vld [vmem:[%s1262_s4 + $0x4] ss:$8 sps:$4 sm:$0xff]   ;;  %v887_v32 = vld [vmem:[%s1260_s0 + $0x70] ss:$8 sps:$4 sm:$0xff]   ;;  %v893_v38 = vld [vmem:[%s1260_s0 + $0x80] ss:$8 sps:$4 sm:$0xff]  }
   0xc   :  { %328 = vmatpush1.bf16.msra.mxu1 %v858_v12  ;;  %166 = vmatprep.subr.bf16.mxu0 %v859_v13  ;;  %v888_v33 = vld [vmem:[%s1261_s1 + $0x70] ss:$8 sps:$4 sm:$0xff]   ;;  %v889_v34 = vld [vmem:[%s1260_s0 + $0x84] ss:$8 sps:$4 sm:$0xff]   ;;  %v894_v39 = vld [vmem:[%s1261_s1 + $0x80] ss:$8 sps:$4 sm:$0xff]  }
   0xd   :  { %329 = vmatprep.subr.bf16.mxu1 %v861_v14  ;;  %768 = vmatprep.mubr.msk.bf16.mxu0 %vm149_vm0, %v899_v31  ;;  %v891_v35 = vld [vmem:[%s1261_s1 + $0x84] ss:$8 sps:$4 sm:$0xff]   ;;  %v44_v36 = vld [vmem:[%s1260_s0 + $0x90] sm:$0x77]  ;;  %v1128_v48 = vld [vmem:[%s1262_s4] ss:$8 sps:$4 sm:$0xff]  }
   0xe   :  { %790 = vmatprep.mubr.msk.bf16.mxu1 %vm149_vm0, %v899_v31  ;;  %v221_v37 = vld [vmem:[%s1261_s1 + $0x90] sm:$0x77]  ;;  %v765_v40 = vcombine.low %v44_v36, %v44_v36  ;;  %v766_v41 = vcombine.high %v44_v36, %v44_v36  ;;  %v904_v46 = vld [vmem:[%s1263_s2 + $0x4] ss:$8 sps:$4 sm:$0xff]   ;;  %v902_v49 = vld [vmem:[%s1263_s2] ss:$8 sps:$4 sm:$0xff]  }
   0xf   :  { %167 = vmatpush1.bf16.msra.mxu0 %v863_v15  ;;  %v788_v42 = vcombine.high %v221_v37, %v221_v37  ;;  %v787_v43 = vcombine.low %v221_v37, %v221_v37  ;;  %v907_v47 = vld [vmem:[%s1264_s3 + $0x4] ss:$8 sps:$4 sm:$0xff]   ;;  %v905_v50 = vld [vmem:[%s1264_s3] ss:$8 sps:$4 sm:$0xff]   ;;  %v910_v51 = vld [vmem:[%s1263_s2 + $0x14] ss:$8 sps:$4 sm:$0xff]  }
  0x10   :  { %330 = vmatpush1.bf16.msra.mxu1 %v864_v16  ;;  %168 = vmatprep.subr.bf16.mxu0 %v865_v17  ;;  %v155_v44 = vsel %vm153_vm1, %v765_v40, 0  ;;  %v913_v52 = vld [vmem:[%s1264_s3 + $0x14] ss:$8 sps:$4 sm:$0xff]   ;;  %v908_v53 = vld [vmem:[%s1263_s2 + $0x10] ss:$8 sps:$4 sm:$0xff]   ;;  %v704_v61 = vld [vmem:[%s1265_s5] sm:$0xff] }
  0x11   :  { %331 = vmatprep.subr.bf16.mxu1 %v867_v18  ;;  %v318_v45 = vsel %vm153_vm1, %v787_v43, 0  ;;  %v911_v54 = vld [vmem:[%s1264_s3 + $0x10] ss:$8 sps:$4 sm:$0xff]   ;;  %v916_v55 = vld [vmem:[%s1263_s2 + $0x24] ss:$8 sps:$4 sm:$0xff]   ;;  %708 = vperm.xlu0 %840, %v704_v61   ;;  %vm737_vm3 = vcmask 588804  }
  0x12   :  { %v919_v56 = vld [vmem:[%s1264_s3 + $0x24] ss:$8 sps:$4 sm:$0xff]   ;;  %v914_v57 = vld [vmem:[%s1263_s2 + $0x20] ss:$8 sps:$4 sm:$0xff]   ;;  %v922_v59 = vld [vmem:[%s1263_s2 + $0x34] ss:$8 sps:$4 sm:$0xff]  }
  0x13   :  { %169 = vmatpush1.bf16.msra.mxu0 %v869_v19  ;;  %v917_v58 = vld [vmem:[%s1264_s3 + $0x20] ss:$8 sps:$4 sm:$0xff]   ;;  %v925_v60 = vld [vmem:[%s1264_s3 + $0x34] ss:$8 sps:$4 sm:$0xff]   ;;  %v920_v62 = vld [vmem:[%s1263_s2 + $0x30] ss:$8 sps:$4 sm:$0xff]  }
  0x14   :  { %332 = vmatpush1.bf16.msra.mxu1 %v870_v20  ;;  %170 = vmatprep.subr.bf16.mxu0 %v871_v21  ;;  %v923_v63 = vld [vmem:[%s1264_s3 + $0x30] ss:$8 sps:$4 sm:$0xff]   ;;  %v705_v0 = vld [vmem:[%s1265_s5 + $0x8] sm:$0xff]  ;;  %v934_v5 = vld [vmem:[%s1263_s2 + $0x54] ss:$8 sps:$4 sm:$0xff]  }
  0x15   :  { %333 = vmatprep.subr.bf16.mxu1 %v873_v22  ;;  %v928_v1 = vld [vmem:[%s1263_s2 + $0x44] ss:$8 sps:$4 sm:$0xff]   ;;  %713 = vperm.xlu0 %840, %v705_v0   ;;  %v926_v3 = vld [vmem:[%s1263_s2 + $0x40] ss:$8 sps:$4 sm:$0xff]   ;;  %v937_v6 = vld [vmem:[%s1264_s3 + $0x54] ss:$8 sps:$4 sm:$0xff]  }
  0x16   :  { %v931_v2 = vld [vmem:[%s1264_s3 + $0x44] ss:$8 sps:$4 sm:$0xff]   ;;  %v929_v4 = vld [vmem:[%s1264_s3 + $0x40] ss:$8 sps:$4 sm:$0xff]   ;;  %v932_v7 = vld [vmem:[%s1263_s2 + $0x50] ss:$8 sps:$4 sm:$0xff]  }
  0x17   :  { %171 = vmatpush1.bf16.msra.mxu0 %v875_v23  ;;  %v935_v8 = vld [vmem:[%s1264_s3 + $0x50] ss:$8 sps:$4 sm:$0xff]   ;;  %v940_v9 = vld [vmem:[%s1263_s2 + $0x64] ss:$8 sps:$4 sm:$0xff]   ;;  %v938_v11 = vld [vmem:[%s1263_s2 + $0x60] ss:$8 sps:$4 sm:$0xff]  }
  0x18   :  { %334 = vmatpush1.bf16.msra.mxu1 %v876_v24  ;;  %172 = vmatprep.subr.bf16.mxu0 %v877_v25  ;;  %v943_v10 = vld [vmem:[%s1264_s3 + $0x64] ss:$8 sps:$4 sm:$0xff]   ;;  %v941_v12 = vld [vmem:[%s1264_s3 + $0x60] ss:$8 sps:$4 sm:$0xff]   ;;  %v946_v13 = vld [vmem:[%s1263_s2 + $0x74] ss:$8 sps:$4 sm:$0xff]  }
  0x19   :  { %335 = vmatprep.subr.bf16.mxu1 %v879_v26  ;;  %v949_v14 = vld [vmem:[%s1264_s3 + $0x74] ss:$8 sps:$4 sm:$0xff]   ;;  %v944_v15 = vld [vmem:[%s1263_s2 + $0x70] ss:$8 sps:$4 sm:$0xff]   ;;  %v952_v17 = vld [vmem:[%s1263_s2 + $0x84] ss:$8 sps:$4 sm:$0xff]  }
  0x1a   :  { %v947_v16 = vld [vmem:[%s1264_s3 + $0x70] ss:$8 sps:$4 sm:$0xff]   ;;  %v955_v18 = vld [vmem:[%s1264_s3 + $0x84] ss:$8 sps:$4 sm:$0xff]   ;;  %v950_v21 = vld [vmem:[%s1263_s2 + $0x80] ss:$8 sps:$4 sm:$0xff]  }
  0x1b   :  { %173 = vmatpush1.bf16.msra.mxu0 %v881_v27  ;;  %v388_v19 = vld [vmem:[%s1263_s2 + $0x90] sm:$0x77]  ;;  %v953_v22 = vld [vmem:[%s1264_s3 + $0x80] ss:$8 sps:$4 sm:$0xff]   ;;  %vm738_vm4 = vmor %vm737_vm3, %vm736_vm2 }
  0x1c   :  { %336 = vmatpush1.bf16.msra.mxu1 %v882_v28  ;;  %174 = vmatprep.subr.bf16.mxu0 %v883_v29  ;;  %v551_v20 = vld [vmem:[%s1264_s3 + $0x90] sm:$0x77]  ;;  %v810_v23 = vcombine.high %v388_v19, %v388_v19  ;;  %v809_v25 = vcombine.low %v388_v19, %v388_v19 }
  0x1d   :  { %337 = vmatprep.subr.bf16.mxu1 %v885_v30  ;;  %v832_v24 = vcombine.high %v551_v20, %v551_v20  ;;  %v831_v26 = vcombine.low %v551_v20, %v551_v20 }
  0x1e   :  { %v485_v27 = vsel %vm153_vm1, %v809_v25, 0 }
  0x1f   :  { %175 = vmatpush1.bf16.msra.mxu0 %v887_v32  ;;  %v648_v28 = vsel %vm153_vm1, %v831_v26, 0 }
  0x20   :  { %338 = vmatpush1.bf16.msra.mxu1 %v888_v33  ;;  %176 = vmatprep.subr.bf16.mxu0 %v889_v34 }
  0x21   :  { %339 = vmatprep.subr.bf16.mxu1 %v891_v35 }
  0x23   :  { %177 = vmatpush1.bf16.msra.mxu0 %v893_v38 }
  0x24   :  { %340 = vmatpush1.bf16.msra.mxu1 %v894_v39  ;;  %767 = vmatprep.subr.msk.bf16.mxu0 %vm153_vm1, %v766_v41 }
  0x25   :  { %789 = vmatprep.subr.msk.bf16.mxu1 %vm153_vm1, %v788_v42 }
  0x27   :  { %179 = vmatpush1.bf16.msra.mxu0 %v155_v44 }
  0x28   :  { %342 = vmatpush1.bf16.msra.mxu1 %v318_v45  ;;  %490 = vmatprep.subr.bf16.mxu0 %v904_v46 }
  0x29   :  { %653 = vmatprep.subr.bf16.mxu1 %v907_v47 }
  0x2a   :  { %193 = vmatmul.mubr.bf16.vlgmr.msra.gmra.mrb[0].mxu0 %v1128_v48 }
  0x2b   :  { %356 = vmatmul.mubr.bf16.vlgmr.msra.gmra.mrb[0].mxu1 %v1128_v48  ;;  %491 = vmatpush1.bf16.msra.mxu0 %v902_v49 }
  0x2c   :  { %654 = vmatpush1.bf16.msra.mxu1 %v905_v50  ;;  %492 = vmatprep.subr.bf16.mxu0 %v910_v51 }
  0x2d   :  { %655 = vmatprep.subr.bf16.mxu1 %v913_v52  ;;  %812 = vmatprep.mubr.msk.bf16.mxu0 %vm149_vm0, %v899_v31 }
  0x2e   :  { %834 = vmatprep.mubr.msk.bf16.mxu1 %vm149_vm0, %v899_v31 }
  0x2f   :  { %493 = vmatpush1.bf16.msra.mxu0 %v908_v53 }
  0x30   :  { %656 = vmatpush1.bf16.msra.mxu1 %v911_v54  ;;  %494 = vmatprep.subr.bf16.mxu0 %v916_v55 }
  0x31   :  { %657 = vmatprep.subr.bf16.mxu1 %v919_v56 }
  0x33   :  { %495 = vmatpush1.bf16.msra.mxu0 %v914_v57 }
  0x34   :  { %658 = vmatpush1.bf16.msra.mxu1 %v917_v58  ;;  %496 = vmatprep.subr.bf16.mxu0 %v922_v59 }
  0x35   :  { %659 = vmatprep.subr.bf16.mxu1 %v925_v60 }
  0x37   :  { %497 = vmatpush1.bf16.msra.mxu0 %v920_v62 }
  0x38   :  { %660 = vmatpush1.bf16.msra.mxu1 %v923_v63  ;;  %498 = vmatprep.subr.bf16.mxu0 %v928_v1 }
  0x39   :  { %661 = vmatprep.subr.bf16.mxu1 %v931_v2 }
  0x3b   :  { %499 = vmatpush1.bf16.msra.mxu0 %v926_v3 }
  0x3c   :  { %662 = vmatpush1.bf16.msra.mxu1 %v929_v4  ;;  %500 = vmatprep.subr.bf16.mxu0 %v934_v5 }
  0x3d   :  { %663 = vmatprep.subr.bf16.mxu1 %v937_v6 }
  0x3f   :  { %501 = vmatpush1.bf16.msra.mxu0 %v932_v7 }
  0x40   :  { %664 = vmatpush1.bf16.msra.mxu1 %v935_v8  ;;  %502 = vmatprep.subr.bf16.mxu0 %v940_v9 }
  0x41   :  { %665 = vmatprep.subr.bf16.mxu1 %v943_v10 }
  0x43   :  { %503 = vmatpush1.bf16.msra.mxu0 %v938_v11 }
  0x44   :  { %666 = vmatpush1.bf16.msra.mxu1 %v941_v12  ;;  %504 = vmatprep.subr.bf16.mxu0 %v946_v13 }
  0x45   :  { %667 = vmatprep.subr.bf16.mxu1 %v949_v14 }
  0x47   :  { %505 = vmatpush1.bf16.msra.mxu0 %v944_v15 }
  0x48   :  { %668 = vmatpush1.bf16.msra.mxu1 %v947_v16  ;;  %506 = vmatprep.subr.bf16.mxu0 %v952_v17 }
  0x49   :  { %669 = vmatprep.subr.bf16.mxu1 %v955_v18 }
  0x4b   :  { %507 = vmatpush1.bf16.msra.mxu0 %v950_v21 }
  0x4c   :  { %670 = vmatpush1.bf16.msra.mxu1 %v953_v22  ;;  %811 = vmatprep.subr.msk.bf16.mxu0 %vm153_vm1, %v810_v23 }
  0x4d   :  { %833 = vmatprep.subr.msk.bf16.mxu1 %vm153_vm1, %v832_v24 }
  0x4f   :  { %509 = vmatpush1.bf16.msra.mxu0 %v485_v27 }
  0x50   :  { %672 = vmatpush1.bf16.msra.mxu1 %v648_v28 }
  0x52   :  { %523 = vmatmul.mubr.bf16.vlgmr.msra.gmra.mrb[4].mxu0 %v1128_v48 }
  0x53   :  { %686 = vmatmul.mubr.bf16.vlgmr.msra.gmra.mrb[4].mxu1 %v1128_v48 }
  0x90   :  { %v709_v41 = vpop.permute.xlu0 %708 }
  0x94   :  { %v714_v59 = vpop.permute.xlu0 %713 }
  0xfd   :  { %v194_v29 = vpop.f32.mrb[0].mxu0 }
  0xfe   :  { %v357_v30 = vpop.f32.mrb[0].mxu1  ;;  %v196_v32 = vpop.f32.mrb[1].mxu0 }
  0xff   :  { %v366_v31 = vmax.f32 %v194_v29, %v357_v30  ;;  %v359_v33 = vpop.f32.mrb[1].mxu1  ;;  %v198_v35 = vpop.f32.mrb[2].mxu0 }
 0x100   :  { %v367_v34 = vmax.f32 %v196_v32, %v359_v33  ;;  %v361_v36 = vpop.f32.mrb[2].mxu1  ;;  %v200_v38 = vpop.f32.mrb[3].mxu0 }
 0x101   :  { %v368_v37 = vmax.f32 %v198_v35, %v361_v36  ;;  %v363_v39 = vpop.f32.mrb[3].mxu1 }
 0x102   :  { %v369_v40 = vmax.f32 %v200_v38, %v363_v39 }
 0x125   :  { %v524_v42 = vpop.f32.mrb[4].mxu0 }
 0x126   :  { %v687_v43 = vpop.f32.mrb[4].mxu1  ;;  %v526_v45 = vpop.f32.mrb[5].mxu0 }
 0x127   :  { %v696_v44 = vmax.f32 %v524_v42, %v687_v43  ;;  %v689_v46 = vpop.f32.mrb[5].mxu1  ;;  %v528_v48 = vpop.f32.mrb[6].mxu0 }
 0x128   :  { %v697_v47 = vmax.f32 %v526_v45, %v689_v46  ;;  %v691_v49 = vpop.f32.mrb[6].mxu1  ;;  %v530_v52 = vpop.f32.mrb[7].mxu0 }
 0x129   :  { %v700_v50 = vmax.f32 %v366_v31, %v696_v44  ;;  %v698_v51 = vmax.f32 %v528_v48, %v691_v49  ;;  %v693_v53 = vpop.f32.mrb[7].mxu1 }
 0x12a   :  { %v701_v54 = vmax.f32 %v367_v34, %v697_v47  ;;  %v699_v55 = vmax.f32 %v530_v52, %v693_v53 }
 0x12b   :  { %v716_v56 = vadd.f32 %v709_v41, %v700_v50  ;;  %v702_v57 = vmax.f32 %v368_v37, %v698_v51 }
 0x12c   :  { %v717_v58 = vadd.f32 %v709_v41, %v701_v54  ;;  %v703_v60 = vmax.f32 %v369_v40, %v699_v55 }
 0x12d   :  { %v720_v61 = vmax.f32 %v716_v56, 0.0  ;;  %v718_v62 = vadd.f32 %v714_v59, %v702_v57 }
 0x12e   :  { %v721_v63 = vmax.f32 %v717_v58, 0.0  ;;  %v719_v0 = vadd.f32 %v714_v59, %v703_v60 }
 0x12f   :  { %v722_v1 = vmax.f32 %v718_v62, 0.0 }
 0x130   :  { %v837_v2 = vpack.c.bf16 %v721_v63, %v720_v61  ;;  %v723_v3 = vmax.f32 %v719_v0, 0.0 }
 0x132   :  { %739 = vst.msk [vmem:[%s1266_s6] sm:$0xff] %vm738_vm4, %v837_v2  ;;  %v838_v4 = vpack.c.bf16 %v723_v3, %v722_v1 }
 0x134   :  { %740 = vst.msk [vmem:[%s1266_s6 + $0x8] sm:$0xff] %vm738_vm4, %v838_v4 }

// kernel: net_forward.5
= control target key start
LH: loop header
LB: loop body
LE: loop exit
PB: predicated region body
PF: predicated region fallthrough
CT: control target
= control target key end

     0   :  { %v742_v0 = vmov 0   ;;  %vm249_vm0 = vcmask 130048   ;;  %v743_v32 = vmov 0.0   ;;  %vm406_vm1 = vcmask 1043456   ;;  %s948_s1 = inlined_call_operand.vmem [shape: bf16[400,120], index: 1, kind: input, shape index: {}]   ;;  %s949_s0 = inlined_call_operand.vmem [shape: bf16[8,400], index: 0, kind: input, shape index: {}]   ;;  %s950_s3 = inlined_call_operand.vmem [shape: bf16[120,84], index: 3, kind: input, shape index: {}]   ;;  %s951_s5 = inlined_call_operand.vmem [shape: bf16[84,10], index: 5, kind: input, shape index: {}]   ;;  %s952_s2 = inlined_call_operand.vmem [shape: f32[1,120], index: 2, kind: input, shape index: {}]   ;;  %s953_s4 = inlined_call_operand.vmem [shape: f32[1,84], index: 4, kind: input, shape index: {}]   ;;  %s954_s6 = inlined_call_operand.vmem [shape: f32[1,10], index: 6, kind: input, shape index: {}]   ;;  %s955_s7 = inlined_call_operand.vmem [shape: f32[8,10], index: 7, kind: output, shape index: {}]  }
   0x1   :  { %293 = vmatprep.subr.bf16.mxu1 %v742_v0  ;;  %v695_v1 = vld [vmem:[%s948_s1 + $0x40] sm:$0xff]   ;;  %v698_v4 = vld [vmem:[%s948_s1 + $0x48] sm:$0xff]   ;;  %v701_v7 = vld [vmem:[%s948_s1 + $0x50] sm:$0xff]   ;;  %vm744_vm2 = vmmov 0   ;;  %vm402_vm3 = vcmask 982016   ;;  %vm507_vm4 = vcmask 1041408  }
   0x2   :  { %v696_v2 = vld [vmem:[%s948_s1 + $0x80] sm:$0xff]   ;;  %618 = vmatprep.subr.bf16.mxu0 %v695_v1  ;;  %v699_v5 = vld [vmem:[%s948_s1 + $0x88] sm:$0xff]   ;;  %v702_v8 = vld [vmem:[%s948_s1 + $0x90] sm:$0xff]   ;;  %vm503_vm5 = vcmask 687104   ;;  %vm551_vm6 = vcmask 80896  }
   0x3   :  { %v697_v3 = vld [vmem:[%s948_s1] sm:$0xff]   ;;  %294 = vmatpush1.bf16.msra.mxu1 %v696_v2  ;;  %v700_v6 = vld [vmem:[%s948_s1 + $0x8] sm:$0xff]   ;;  %v703_v9 = vld [vmem:[%s948_s1 + $0x10] sm:$0xff]  }
   0x4   :  { %619 = vmatpush3.bf16.msra.mxu0 %v697_v3  ;;  %295 = vmatprep.subr.bf16.mxu1 %v742_v0  ;;  %v704_v10 = vld [vmem:[%s948_s1 + $0x58] sm:$0xff]   ;;  %v707_v13 = vld [vmem:[%s948_s1 + $0x60] sm:$0xff]   ;;  %v710_v16 = vld [vmem:[%s948_s1 + $0x68] sm:$0xff]  }
   0x5   :  { %620 = vmatprep.subr.bf16.mxu0 %v698_v4  ;;  %v705_v11 = vld [vmem:[%s948_s1 + $0x98] sm:$0xff]   ;;  %v708_v14 = vld [vmem:[%s948_s1 + $0xa0] sm:$0xff]   ;;  %v711_v17 = vld [vmem:[%s948_s1 + $0xa8] sm:$0xff]  }
   0x6   :  { %v706_v12 = vld [vmem:[%s948_s1 + $0x18] sm:$0xff]   ;;  %v709_v15 = vld [vmem:[%s948_s1 + $0x20] sm:$0xff]   ;;  %v712_v18 = vld [vmem:[%s948_s1 + $0x28] sm:$0xff]  }
   0x7   :  { %296 = vmatpush1.bf16.msra.mxu1 %v699_v5  ;;  %v713_v19 = vld [vmem:[%s948_s1 + $0x70] sm:$0xff]   ;;  %v27_v22 = vld [vmem:[%s949_s0] sm:$0xff]  ;;  %v716_v23 = vld [vmem:[%s948_s1 + $0x78] sm:$0xff]  }
   0x8   :  { %621 = vmatpush3.bf16.msra.mxu0 %v700_v6  ;;  %297 = vmatprep.subr.bf16.mxu1 %v742_v0  ;;  %v714_v20 = vld [vmem:[%s948_s1 + $0xb0] sm:$0xff]   ;;  %v571_v24 = vcombine.high %v27_v22, %v27_v22  ;;  %v28_v25 = vld [vmem:[%s949_s0 + $0x8] sm:$0xff]  ;;  %v717_v27 = vld [vmem:[%s948_s1 + $0xb8] sm:$0xff]   ;;  %v570_v30 = vcombine.low %v27_v22, %v27_v22 }
   0x9   :  { %622 = vmatprep.subr.bf16.mxu0 %v701_v7  ;;  %v715_v21 = vld [vmem:[%s948_s1 + $0x30] sm:$0xff]   ;;  %v573_v26 = vcombine.high %v28_v25, %v28_v25  ;;  %v718_v28 = vld [vmem:[%s948_s1 + $0x38] sm:$0xff]   ;;  %v721_v29 = vld [vmem:[%s948_s1 + $0xc0] sm:$0xff]   ;;  %v572_v33 = vcombine.low %v28_v25, %v28_v25 }
   0xa   :  { %285 = vmatprep.mubr.bf16.mxu0 %v571_v24  ;;  %v724_v31 = vld [vmem:[%s950_s3] sm:$0xff]   ;;  %v725_v34 = vld [vmem:[%s950_s3 + $0x8] sm:$0xff]   ;;  %v726_v35 = vld [vmem:[%s950_s3 + $0x10] sm:$0xff]  }
   0xb   :  { %298 = vmatpush1.bf16.msra.mxu1 %v702_v8  ;;  %599 = vmatprep.mubr.msk.bf16.mxu1 %vm249_vm0, %v573_v26  ;;  %v727_v36 = vld [vmem:[%s950_s3 + $0x18] sm:$0xff]   ;;  %v728_v37 = vld [vmem:[%s950_s3 + $0x20] sm:$0xff]   ;;  %v729_v38 = vld [vmem:[%s950_s3 + $0x28] sm:$0xff]  }
   0xc   :  { %623 = vmatpush3.bf16.msra.mxu0 %v703_v9  ;;  %299 = vmatprep.subr.bf16.mxu1 %v742_v0  ;;  %v730_v39 = vld [vmem:[%s950_s3 + $0x30] sm:$0xff]   ;;  %v731_v40 = vld [vmem:[%s950_s3 + $0x38] ss:$0 sps:$4 sm:$0xff]   ;;  %v732_v42 = vld [vmem:[%s951_s5] sm:$0xff]  }
   0xd   :  { %624 = vmatprep.subr.bf16.mxu0 %v704_v10  ;;  %v408_v41 = vsel %vm406_vm1, %v731_v40, 0  ;;  %v733_v43 = vld [vmem:[%s951_s5 + $0x8] sm:$0xff]   ;;  %v734_v44 = vld [vmem:[%s951_s5 + $0x10] sm:$0xff]   ;;  %v735_v45 = vld [vmem:[%s951_s5 + $0x18] sm:$0xff]  }
   0xe   :  { %v569_v48 = vld [vmem:[%s952_s2] ss:$0 sm:$0xff]  ;;  %v737_v61 = vld [vmem:[%s951_s5 + $0x28] ss:$0 sps:$4 sm:$0x33]  }
   0xf   :  { %300 = vmatpush1.bf16.msra.mxu1 %v705_v11  ;;  %v736_v60 = vld [vmem:[%s951_s5 + $0x20] sm:$0xff]   ;;  %v509_v62 = vsel %vm507_vm4, %v737_v61, 0 }
  0x10   :  { %625 = vmatpush3.bf16.msra.mxu0 %v706_v12  ;;  %301 = vmatprep.subr.bf16.mxu1 %v742_v0  ;;  %v600_v63 = vld [vmem:[%s953_s4] ss:$0 sm:$0xff] }
  0x11   :  { %626 = vmatprep.subr.bf16.mxu0 %v707_v13  ;;  %v610_v7 = vld [vmem:[%s954_s6] ss:$0 sm:$0xff] }
  0x13   :  { %302 = vmatpush1.bf16.msra.mxu1 %v708_v14 }
  0x14   :  { %627 = vmatpush3.bf16.msra.mxu0 %v709_v15  ;;  %303 = vmatprep.subr.bf16.mxu1 %v742_v0 }
  0x15   :  { %628 = vmatprep.subr.bf16.mxu0 %v710_v16 }
  0x17   :  { %304 = vmatpush1.bf16.msra.mxu1 %v711_v17 }
  0x18   :  { %629 = vmatpush3.bf16.msra.mxu0 %v712_v18  ;;  %305 = vmatprep.subr.bf16.mxu1 %v742_v0 }
  0x19   :  { %630 = vmatprep.subr.bf16.mxu0 %v713_v19 }
  0x1b   :  { %306 = vmatpush1.bf16.msra.mxu1 %v714_v20 }
  0x1c   :  { %631 = vmatpush3.bf16.msra.mxu0 %v715_v21  ;;  %307 = vmatprep.subr.bf16.mxu1 %v742_v0 }
  0x1d   :  { %632 = vmatprep.subr.bf16.mxu0 %v716_v23 }
  0x1f   :  { %308 = vmatpush1.bf16.msra.mxu1 %v717_v27 }
  0x20   :  { %633 = vmatpush3.bf16.msra.mxu0 %v718_v28  ;;  %309 = vmatprep.subr.bf16.mxu1 %v742_v0 }
  0x21   :  { %656 = vmatprep.subr.bf16.mxu0 %v743_v32 }
  0x23   :  { %286 = vmatmul.mubr.bf16.vlgmr.msra.gmra.mrb[0].mxu0 %v570_v30  ;;  %310 = vmatpush1.bf16.msra.mxu1 %v721_v29 }
  0x24   :  { %657 = vmatpush3.bf16.msra.mxu0 %v724_v31  ;;  %676 = vmatprep.subr.bf16.mxu1 %v743_v32 }
  0x25   :  { %658 = vmatprep.subr.bf16.mxu0 %v743_v32  ;;  %672 = vmatprep.mubr.msk.bf16.mxu0 %vm744_vm2, %v743_v32 }
  0x26   :  { %326 = vmatmul.mubr.bf16.vlgmr.msra.gmra.mrb[0].mxu1 %v572_v33 }
  0x27   :  { %688 = vmatprep.mubr.msk.bf16.mxu1 %vm744_vm2, %v743_v32  ;;  %677 = vmatpush3.bf16.msra.mxu1 %v732_v42 }
  0x28   :  { %659 = vmatpush3.bf16.msra.mxu0 %v725_v34  ;;  %678 = vmatprep.subr.bf16.mxu1 %v743_v32 }
  0x29   :  { %660 = vmatprep.subr.bf16.mxu0 %v743_v32 }
  0x2b   :  { %679 = vmatpush3.bf16.msra.mxu1 %v733_v43 }
  0x2c   :  { %661 = vmatpush3.bf16.msra.mxu0 %v726_v35  ;;  %680 = vmatprep.subr.bf16.mxu1 %v743_v32 }
  0x2d   :  { %662 = vmatprep.subr.bf16.mxu0 %v743_v32 }
  0x2f   :  { %681 = vmatpush3.bf16.msra.mxu1 %v734_v44 }
  0x30   :  { %663 = vmatpush3.bf16.msra.mxu0 %v727_v36  ;;  %682 = vmatprep.subr.bf16.mxu1 %v743_v32 }
  0x31   :  { %664 = vmatprep.subr.bf16.mxu0 %v743_v32 }
  0x33   :  { %683 = vmatpush3.bf16.msra.mxu1 %v735_v45 }
  0x34   :  { %665 = vmatpush3.bf16.msra.mxu0 %v728_v37  ;;  %684 = vmatprep.subr.bf16.mxu1 %v743_v32 }
  0x35   :  { %666 = vmatprep.subr.bf16.mxu0 %v743_v32 }
  0x37   :  { %685 = vmatpush3.bf16.msra.mxu1 %v736_v60 }
  0x38   :  { %667 = vmatpush3.bf16.msra.mxu0 %v729_v38  ;;  %686 = vmatprep.subr.bf16.mxu1 %v743_v32 }
  0x39   :  { %668 = vmatprep.subr.bf16.mxu0 %v743_v32 }
  0x3b   :  { %687 = vmatpush3.bf16.msra.mxu1 %v509_v62 }
  0x3c   :  { %669 = vmatpush3.bf16.msra.mxu0 %v730_v39 }
  0x3d   :  { %670 = vmatprep.subr.bf16.mxu0 %v743_v32 }
  0x40   :  { %671 = vmatpush3.bf16.msra.mxu0 %v408_v41 }
  0xf6   :  { %v634_v46 = vpop.f32.mrb[0].mxu0 }
  0xf7   :  { %v635_v47 = vpop.f32.mrb[1].mxu0 }
  0xf8   :  { %v636_v49 = vadd.f32 %v635_v47, %v634_v46  ;;  %v637_v50 = vpop.f32.mrb[2].mxu0 }
  0xf9   :  { %v638_v51 = vpop.f32.mrb[3].mxu0  ;;  %v327_v52 = vpop.f32.mrb[0].mxu1 }
  0xfa   :  { %v288_v53 = vadd.f32 %v636_v49, %v569_v48  ;;  %v329_v54 = vpop.f32.mrb[1].mxu1 }
  0xfb   :  { %v330_v55 = vpop.f32.mrb[2].mxu1 }
  0xfc   :  { %v328_v56 = vadd.f32 %v327_v52, %v288_v53  ;;  %v331_v57 = vpop.f32.mrb[3].mxu1 }
  0xfe   :  { %v333_v58 = vmax.f32 %v328_v56, 0.0 }
 0x100   :  { %v334_v59 = vpack.c.bf16 %v333_v58, %v333_v58 }
 0x102   :  { %673 = vmatmul.mubr.msk.bf16.vlgmr.msra.gmra.mrb[4].mxu0 %vm402_vm3, %v334_v59 }
 0x1d5   :  { %v444_v0 = vpop.f32.mrb[4].mxu0 }
 0x1d6   :  { %v445_v1 = vadd.f32 %v600_v63, %v444_v0  ;;  %v674_v2 = vpop.f32.mrb[5].mxu0 }
 0x1d7   :  { %v447_v3 = vpop.f32.mrb[6].mxu0 }
 0x1d8   :  { %v450_v4 = vmax.f32 %v445_v1, 0.0  ;;  %v675_v5 = vpop.f32.mrb[7].mxu0 }
 0x1da   :  { %v451_v6 = vpack.c.bf16 %v450_v4, %v450_v4 }
 0x1dc   :  { %689 = vmatmul.mubr.msk.bf16.vlgmr.msra.gmra.mrb[4].mxu1 %vm503_vm5, %v451_v6 }
 0x2af   :  { %v545_v8 = vpop.f32.mrb[4].mxu1 }
 0x2b0   :  { %v546_v9 = vadd.f32 %v610_v7, %v545_v8  ;;  %v690_v10 = vpop.f32.mrb[5].mxu1 }
 0x2b1   :  { %v548_v11 = vpop.f32.mrb[6].mxu1 }
 0x2b2   :  { %v691_v12 = vpop.f32.mrb[7].mxu1  ;;  %v552_v13 = vsel %vm551_vm6, %v546_v9, -inf }
 0x2b3   :  { %553 = vmax.xlane.f32.xlu0 %v552_v13 }
 0x340   :  { %v554_v14 = vpop.xlane.xlu0 %553 }
 0x341   :  { %v555_v15 = vsub.f32 %v546_v9, %v554_v14 }
 0x343   :  { %v556_v16 = vmul.f32 1.442695, %v555_v15 }
 0x345   :  { %738 = vpow2.f32 %v556_v16 }
 0x34f   :  { %v739_v17 = vpop.eup %738 }
 0x350   :  { %v558_v18 = vsel %vm551_vm6, %v739_v17, 0.0 }
 0x351   :  { %559 = vadd.xlane.f32.xlu0 %v558_v18 }
 0x3de   :  { %v560_v19 = vpop.xlane.xlu0 %559 }
 0x3df   :  { %740 = vlog2.f32 %v560_v19 }
 0x3e9   :  { %v741_v20 = vpop.eup %740 }
 0x3ea   :  { %v562_v21 = vmul.f32 0.6931472, %v741_v20 }
 0x3ec   :  { %v563_v22 = vsub.f32 %v555_v15, %v562_v21 }
 0x3ee   :  { %564 = vst.msk [vmem:[%s955_s7] sm:$0xff] %vm551_vm6, %v563_v22 }

</bundles_post_ra>
